<compile_context>
chip_gen: v7x
topology: tpu7x:2x2x1
jax: 0.10.0
libtpu: 0.0.40
codegen_flags: <defaults>
</compile_context>

<pallas_src>
import functools

import jax
import jax.numpy as jnp
from jax import lax
from jax.experimental import pallas as pl
from jax.experimental.pallas import tpu as pltpu


HIDDEN = 128   # lstm1 hidden size (module default)
OUT = 128      # lstm2 hidden size (module default)
INPUT = 1024   # input feature size (module default)


# ---------------------------------------------------------------------------
# Kernel 1: batched input projection for lstm1, batch-major (no transpose).
#   xproj = x2d @ W_ih1^T + (b_ih1 + b_hh1),   x2d = feats.reshape(B*T, 1024)
# Tiled over M = B*T rows so DMA pipelines with the MXU; K (1024) and N (512)
# stay whole (weight block is 2 MiB f32, fine with double buffering).
# ---------------------------------------------------------------------------
def _proj_kernel(x_ref, w_ref, b_ref, o_ref):
    o_ref[...] = (
        jnp.dot(x_ref[...], w_ref[...], preferred_element_type=jnp.float32)
        + b_ref[...]
    )


def input_projection(x, w, b, *, tm=512):
    # x: [M, K], w: [K, N], b: [1, N] -> [M, N]
    M, K = x.shape
    N = w.shape[1]
    tm = min(tm, M)                      # small M -> single full block
    return pl.pallas_call(
        _proj_kernel,
        out_shape=jax.ShapeDtypeStruct((M, N), jnp.float32),
        grid=(pl.cdiv(M, tm),),
        in_specs=[
            pl.BlockSpec((tm, K), lambda i: (i, 0)),
            pl.BlockSpec((K, N), lambda i: (0, 0)),
            pl.BlockSpec((1, N), lambda i: (0, 0)),
        ],
        out_specs=pl.BlockSpec((tm, N), lambda i: (i, 0)),
        compiler_params=pltpu.CompilerParams(
            dimension_semantics=("parallel",)),
    )(x, w, b)


# ---------------------------------------------------------------------------
# Kernel 2: fused two-cell LSTM recurrence, chunked over time.
#   xproj   [B, T, 4H]  (lstm1 input projection, both lstm1 biases folded in)
#   whh1_t  [H, 4H]     = W_hh1^T
#   w2cat   [H+O, 4O]   = [W_ih2^T ; W_hh2^T]   (fused lstm2 weight)
#   b2      [1, 4O]     = b_ih2 + b_hh2
#   out     [B, O]      = final h2
# PyTorch LSTMCell gate order: i, f, g, o.
# ---------------------------------------------------------------------------
def _recurrence_kernel(xproj_ref, whh1_ref, w2_ref, b2_ref, out_ref,
                       h1, c1, h2, c2,
                       *, hidden, out_size, seq_len, time_chunk, unroll):
    H, O = hidden, out_size
    B = out_ref.shape[0]
    chunk = pl.program_id(0)

    # State scratch persists across grid steps: initialise once.
    @pl.when(chunk == 0)
    def _():
        h1[...] = jnp.zeros_like(h1)
        c1[...] = jnp.zeros_like(c1)
        h2[...] = jnp.zeros_like(h2)
        c2[...] = jnp.zeros_like(c2)

    # Hoisted out of the time loop (JAX does not CSE broadcast_in_dim).
    b2b = jnp.broadcast_to(b2_ref[...], (B, 4 * O))

    def step(j, carry):
        # lstm1 input projection for time step chunk*time_chunk + j.
        x_t = xproj_ref[:, pl.ds(j, 1), :].reshape(B, 4 * H)

        # ----- lstm1 cell -----
        g1 = x_t + jnp.dot(h1[...].astype(whh1_ref.dtype), whh1_ref[...],
                           preferred_element_type=jnp.float32)
        i1 = jax.nn.sigmoid(g1[:, 0 * H:1 * H])
        f1 = jax.nn.sigmoid(g1[:, 1 * H:2 * H])
        gg1 = jnp.tanh(g1[:, 2 * H:3 * H])
        o1 = jax.nn.sigmoid(g1[:, 3 * H:4 * H])
        c1_new = f1 * c1[...] + i1 * gg1
        h1_new = o1 * jnp.tanh(c1_new)
        c1[...] = c1_new
        h1[...] = h1_new

        # ----- lstm2 cell: single fused K = H + O matmul -----
        lhs2 = jnp.concatenate([h1_new, h2[...]], axis=1).astype(w2_ref.dtype)
        g2 = jnp.dot(lhs2, w2_ref[...],
                     preferred_element_type=jnp.float32) + b2b
        i2 = jax.nn.sigmoid(g2[:, 0 * O:1 * O])
        f2 = jax.nn.sigmoid(g2[:, 1 * O:2 * O])
        gg2 = jnp.tanh(g2[:, 2 * O:3 * O])
        o2 = jax.nn.sigmoid(g2[:, 3 * O:4 * O])
        c2_new = f2 * c2[...] + i2 * gg2
        h2_new = o2 * jnp.tanh(c2_new)
        c2[...] = c2_new
        h2[...] = h2_new
        return carry

    if seq_len % time_chunk == 0:
        # Static trip count: give the LLO scheduler visibility for short loops.
        lax.fori_loop(0, time_chunk, step, 0, unroll=unroll)
    else:
        # Ragged final chunk: only process the valid time steps.
        steps = jnp.minimum(time_chunk, seq_len - chunk * time_chunk)
        lax.fori_loop(0, steps, step, 0)

    @pl.when(chunk == pl.num_programs(0) - 1)
    def _():
        out_ref[...] = h2[...]


def lstm_recurrence(xproj, whh1_t, w2cat, b2, *, hidden, out_size,
                    time_chunk=128):
    B, T, G = xproj.shape
    tt = T if T <= time_chunk else time_chunk
    if tt < T:
        tt = max(8, (tt // 8) * 8)       # (8,128) block constraint on (tt, 4H)
    num_chunks = pl.cdiv(T, tt)

    kernel = functools.partial(
        _recurrence_kernel, hidden=hidden, out_size=out_size, seq_len=T,
        time_chunk=tt, unroll=(tt <= 16))

    # TODO(synk): weights/b2 have constant index maps (fetched once); with
    #             pipeline_mode=pl.Buffered(1) their dead second buffer could
    #             be dropped to shave VMEM further.
    return pl.pallas_call(
        kernel,
        out_shape=jax.ShapeDtypeStruct((B, out_size), jnp.float32),
        grid=(num_chunks,),
        in_specs=[
            pl.BlockSpec((B, tt, G), lambda i: (0, i, 0)),
            pl.BlockSpec(whh1_t.shape, lambda i: (0, 0)),
            pl.BlockSpec(w2cat.shape, lambda i: (0, 0)),
            pl.BlockSpec((1, 4 * out_size), lambda i: (0, 0)),
        ],
        out_specs=pl.BlockSpec((B, out_size), lambda i: (0, 0)),
        scratch_shapes=[
            pltpu.VMEM((B, hidden), jnp.float32),    # h1
            pltpu.VMEM((B, hidden), jnp.float32),    # c1
            pltpu.VMEM((B, out_size), jnp.float32),  # h2
            pltpu.VMEM((B, out_size), jnp.float32),  # c2
        ],
        compiler_params=pltpu.CompilerParams(
            dimension_semantics=("arbitrary",)),
    )(xproj, whh1_t, w2cat, b2)


# ---------------------------------------------------------------------------
# Full forward.  Wrapper-side work is only free reshapes, bias folding and the
# one-off lstm2 weight concatenation -- no HBM transpose of the activations.
# ---------------------------------------------------------------------------
def feat_aggregate_forward(params, feats, *, recurrence_dtype=jnp.float32,
                           time_chunk=128):
    B, T, D = feats.shape
    H = params["w_hh1"].shape[1]
    O = params["w_hh2"].shape[1]

    x2d = feats.reshape(B * T, D)                                  # free
    b1 = (params["b_ih1"] + params["b_hh1"])[None, :]              # [1, 4H]
    xproj = input_projection(x2d, params["w_ih1"].T, b1)           # [B*T, 4H]
    xproj = xproj.reshape(B, T, 4 * H)                             # free

    # Recurrence weights (optionally bf16 for the MXU; accumulation stays f32).
    whh1_t = params["w_hh1"].T.astype(recurrence_dtype)            # [H, 4H]
    w2cat = jnp.concatenate(
        [params["w_ih2"].T, params["w_hh2"].T], axis=0
    ).astype(recurrence_dtype)                                     # [H+O, 4O]
    b2 = (params["b_ih2"] + params["b_hh2"])[None, :]              # [1, 4O]

    return lstm_recurrence(xproj, whh1_t, w2cat, b2,
                           hidden=H, out_size=O, time_chunk=time_chunk)


# ---------------------------------------------------------------------------
# Deterministic parameter init (shapes match nn.LSTMCell)
# ---------------------------------------------------------------------------
def init_params(key, input_size=INPUT, hidden_size=HIDDEN, out_size=OUT):
    ks = jax.random.split(key, 8)

    def u(k, shape, scale=0.05):
        return jax.random.uniform(k, shape, jnp.float32, -1.0, 1.0) * scale

    return dict(
        w_ih1=u(ks[0], (4 * hidden_size, input_size)),
        w_hh1=u(ks[1], (4 * hidden_size, hidden_size)),
        b_ih1=u(ks[2], (4 * hidden_size,)),
        b_hh1=u(ks[3], (4 * hidden_size,)),
        w_ih2=u(ks[4], (4 * out_size, hidden_size)),
        w_hh2=u(ks[5], (4 * out_size, out_size)),
        b_ih2=u(ks[6], (4 * out_size,)),
        b_hh2=u(ks[7], (4 * out_size,)),
    )


# ---------------------------------------------------------------------------
# Pure-JAX reference (mirrors the PyTorch forward) for validation
# ---------------------------------------------------------------------------
def reference_forward(params, feats):
    B, T, _ = feats.shape
    H = params["w_hh1"].shape[1]
    O = params["w_hh2"].shape[1]
    hp = jax.lax.Precision.HIGHEST

    def cell(x, h, c, w_ih, w_hh, b_ih, b_hh):
        gates = (jnp.dot(x, w_ih.T, precision=hp) + b_ih
                 + jnp.dot(h, w_hh.T, precision=hp) + b_hh)
        i, f, g, o = jnp.split(gates, 4, axis=-1)
        c = jax.nn.sigmoid(f) * c + jax.nn.sigmoid(i) * jnp.tanh(g)
        h = jax.nn.sigmoid(o) * jnp.tanh(c)
        return h, c

    def step(carry, x_t):
        h1, c1, h2, c2 = carry
        h1, c1 = cell(x_t, h1, c1, params["w_ih1"], params["w_hh1"],
                      params["b_ih1"], params["b_hh1"])
        h2, c2 = cell(h1, h2, c2, params["w_ih2"], params["w_hh2"],
                      params["b_ih2"], params["b_hh2"])
        return (h1, c1, h2, c2), None

    init = (jnp.zeros((B, H), jnp.float32), jnp.zeros((B, H), jnp.float32),
            jnp.zeros((B, O), jnp.float32), jnp.zeros((B, O), jnp.float32))
    (h1, c1, h2, c2), _ = lax.scan(step, init, jnp.transpose(feats, (1, 0, 2)))
    return h2


if __name__ == "__main__":
    key = jax.random.PRNGKey(0)
    kp, kx, kx2 = jax.random.split(key, 3)
    params = init_params(kp)

    # ---- Test 1: demo shape (single time chunk), f32 + bf16-weight paths ----
    B, T = 2, 8
    feats = jax.random.normal(kx, (B, T, INPUT), jnp.float32)
    ref = jax.block_until_ready(reference_forward(params, feats))

    out = jax.block_until_ready(feat_aggregate_forward(params, feats))
    assert out.shape == (B, OUT), out.shape
    err = float(jnp.max(jnp.abs(out - ref)))
    # Typically ~1e-5; bound kept at 1e-2 only to tolerate possible
    # single-pass-bf16 MXU handling of the K=1024 projection dot.
    if err > 1e-2:
        raise AssertionError(f"f32 path mismatch: max abs err {err}")

    out_bf16 = jax.block_until_ready(
        feat_aggregate_forward(params, feats, recurrence_dtype=jnp.bfloat16))
    err_bf16 = float(jnp.max(jnp.abs(out_bf16 - ref)))
    if err_bf16 > 5e-2:   # deliberately relaxed: bf16 recurrence weights
        raise AssertionError(f"bf16-weight path mismatch: max abs err {err_bf16}")

    # ---- Test 2: multiple time chunks (state carried across grid steps) ----
    T2 = 24
    feats2 = jax.random.normal(kx2, (B, T2, INPUT), jnp.float32)
    ref2 = jax.block_until_ready(reference_forward(params, feats2))
    out2 = jax.block_until_ready(
        feat_aggregate_forward(params, feats2, time_chunk=8))
    err2 = float(jnp.max(jnp.abs(out2 - ref2)))
    if err2 > 1e-2:
        raise AssertionError(f"chunked path mismatch: max abs err {err2}")

    print("KERNEL_OK")
</pallas_src>

<mosaic_0001>
module attributes {stable_mosaic.version = 11 : i64} {
  func.func @_proj_kernel(%arg0: i32, %arg1: memref<16x1024xf32, #tpu.memory_space<vmem>>, %arg2: memref<1024x512xf32, #tpu.memory_space<vmem>>, %arg3: memref<1x512xf32, #tpu.memory_space<vmem>>, %arg4: memref<16x512xf32, #tpu.memory_space<vmem>>) attributes {dimension_semantics = [#tpu.dimension_semantics<parallel>], iteration_bounds = array<i64: 1>, scalar_prefetch = 0 : i64, scratch_operands = 0 : i64, tpu.core_type = #tpu.core_type<tc>, window_params = [{transform_indices = @transform_0, window_bounds = array<i64: 16, 1024>}, {pipeline_mode = #tpu.pipeline_mode<synchronous>, transform_indices = @transform_1, window_bounds = array<i64: 1024, 512>}, {pipeline_mode = #tpu.pipeline_mode<synchronous>, transform_indices = @transform_2, window_bounds = array<i64: 1, 512>}, {transform_indices = @transform_3, window_bounds = array<i64: 16, 512>}]} {
    %c0 = arith.constant 0 : index
    %c0_0 = arith.constant 0 : index
    %0 = vector.load %arg1[%c0, %c0_0] : memref<16x1024xf32, #tpu.memory_space<vmem>>, vector<16x1024xf32>
    %c0_1 = arith.constant 0 : index
    %c0_2 = arith.constant 0 : index
    %1 = vector.load %arg2[%c0_1, %c0_2] : memref<1024x512xf32, #tpu.memory_space<vmem>>, vector<1024x512xf32>
    %cst = arith.constant dense<0.000000e+00> : vector<16x512xf32>
    %2 = tpu.matmul %0, %1, %cst {dimension_numbers = #tpu.dot_dimension_numbers<[1], [0], [0], [1], [0, 0, 1, 1], [], []>} : vector<16x1024xf32>, vector<1024x512xf32>, vector<16x512xf32> -> vector<16x512xf32>
    %c0_3 = arith.constant 0 : index
    %c0_4 = arith.constant 0 : index
    %3 = vector.load %arg3[%c0_3, %c0_4] : memref<1x512xf32, #tpu.memory_space<vmem>>, vector<1x512xf32>
    %4 = vector.broadcast %3 : vector<1x512xf32> to vector<16x512xf32>
    %5 = arith.addf %2, %4 : vector<16x512xf32>
    %c0_5 = arith.constant 0 : index
    %c0_6 = arith.constant 0 : index
    %6 = vector.load %arg4[%c0_5, %c0_6] : memref<16x512xf32, #tpu.memory_space<vmem>>, vector<16x512xf32>
    tpu.vector_store %arg4[%c0_5, %c0_6], %5 {strides = array<i32>} : memref<16x512xf32, #tpu.memory_space<vmem>>, vector<16x512xf32>,
    return
  }
  func.func @transform_0(%arg0: i32) -> (i32, i32) {
    %c0_i32 = arith.constant 0 : i32
    %c0_i32_0 = arith.constant 0 : i32
    return %arg0, %c0_i32 : i32, i32
  }
  func.func @transform_1(%arg0: i32) -> (i32, i32) {
    %c0_i32 = arith.constant 0 : i32
    %c0_i32_0 = arith.constant 0 : i32
    %c0_i32_1 = arith.constant 0 : i32
    return %c0_i32, %c0_i32_0 : i32, i32
  }
  func.func @transform_2(%arg0: i32) -> (i32, i32) {
    %c0_i32 = arith.constant 0 : i32
    %c0_i32_0 = arith.constant 0 : i32
    %c0_i32_1 = arith.constant 0 : i32
    return %c0_i32, %c0_i32_0 : i32, i32
  }
  func.func @transform_3(%arg0: i32) -> (i32, i32) {
    %c0_i32 = arith.constant 0 : i32
    %c0_i32_0 = arith.constant 0 : i32
    return %arg0, %c0_i32 : i32, i32
  }
}

</mosaic_0001>

<bundles_post_ra>
// kernel: tpu_custom_call.1
= control target key start
LH: loop header
LB: loop body
LE: loop exit
PB: predicated region body
PF: predicated region fallthrough
CT: control target
= control target key end

     0   :  { %8 = vsyncpa [#allocation3], 0  ;;  %s1974_s0 = inlined_call_operand.hbm [shape: f32[16,1024], index: 0, kind: input, shape index: {}]   ;;  %s1975_s1 = inlined_call_operand.hbm [shape: f32[1024,512], index: 1, kind: input, shape index: {}]   ;;  %s1976_s2 = inlined_call_operand.hbm [shape: f32[1,512], index: 2, kind: input, shape index: {}]   ;;  %s1977_s3 = inlined_call_operand.hbm [shape: f32[16,512], index: 3, kind: output, shape index: {}]  }
   0x1   :  { %9 = vsyncpa [#allocation6], 0 }
   0x2   :  { %10 = vsyncpa [#allocation4], 0  ;;  %s1892_s12 = smov [#allocation5]   ;;  %s1798_s16 = scalar_lea.hbm %s1975_s1, 65536 }
   0x3   :  { %s28_s13 = sshll.u32 %s1892_s12, 4  ;;  %p1799_p0 = scmp.ne.s32.totalorder %s1975_s1, %s1798_s16  ;;  %s29_s13 = int_to_ptr.vmem [resolvable:$true] %s28_s13 }
   0x4   :  { %p1802_p1 = scmp.lt.u32.totalorder %s1798_s16, %s1975_s1 }
   0x6   :  { %p1804_p2 = pnand %p1802_p1, %p1799_p0 }
   0x8   :  { %1807 = shalt.err (!%p1804_p2)
}
   0x9   :  { %s1808_s21 = scalar_lea.vmem %s29_s13, 65536  ;;  %p1813_p4 = scmp.lt.s32.totalorder %s29_s13, %s29_s13 }
   0xa   :  { %p1809_p3 = scmp.ne.s32.totalorder %s29_s13, %s1808_s21  ;;  %p1814_p5 = scmp.lt.s32.totalorder %s1808_s21, %s1808_s21 }
   0xc   :  { %p1815_p6 = por %p1814_p5, %p1813_p4 }
   0xe   :  { %p1816_p7 = pnand %p1815_p6, %p1809_p3 }
  0x10   :  { %1819 = shalt.err (!%p1816_p7)
}
  0x11   :  { %s1893_s22 = smov 512   ;;  %s1894_s23 = smov 32  }
  0x12   :  { %34 = dma.hbm_to_vmem [thread:$0]  %s1975_s1, 65536, %s29_s13, [#allocation6], %s1893_s22, %s1893_s22, %s1894_s23  }
  0x13   :  { %s1895_s26 = smov [#allocation2]   ;;  %s1820_s30 = scalar_lea.hbm %s1974_s0, 2048 }
  0x14   :  { %s16_s27 = sshll.u32 %s1895_s26, 4  ;;  %p1821_p8 = scmp.ne.s32.totalorder %s1974_s0, %s1820_s30  ;;  %s17_s27 = int_to_ptr.vmem [resolvable:$true] %s16_s27 }
  0x15   :  { %p1824_p9 = scmp.lt.u32.totalorder %s1820_s30, %s1974_s0 }
  0x17   :  { %p1826_p10 = pnand %p1824_p9, %p1821_p8 }
  0x19   :  { %1829 = shalt.err (!%p1826_p10)
}
  0x1a   :  { %s1830_s8 = scalar_lea.vmem %s17_s27, 2048  ;;  %p1835_p12 = scmp.lt.s32.totalorder %s17_s27, %s17_s27 }
  0x1b   :  { %p1831_p11 = scmp.ne.s32.totalorder %s17_s27, %s1830_s8  ;;  %p1836_p13 = scmp.lt.s32.totalorder %s1830_s8, %s1830_s8 }
  0x1d   :  { %p1837_p0 = por %p1836_p13, %p1835_p12 }
  0x1f   :  { %p1838_p1 = pnand %p1837_p0, %p1831_p11 }
  0x21   :  { %1841 = shalt.err (!%p1838_p1)
}
  0x22   :  { %s1896_s1 = smov 1024   ;;  %s1897_s9 = smov 64  }
  0x23   :  { %22 = dma.hbm_to_vmem [thread:$0]  %s1974_s0, 2048, %s17_s27, [#allocation3], %s1896_s1, %s1896_s1, %s1897_s9  }
  0x24   :  { %s1898_s12 = smov [#allocation7]   ;;  %s1842_s16 = scalar_lea.hbm %s1976_s2, 64 }
  0x25   :  { %s41_s13 = sshll.u32 %s1898_s12, 4  ;;  %p1843_p2 = scmp.ne.s32.totalorder %s1976_s2, %s1842_s16  ;;  %s42_s13 = int_to_ptr.vmem [resolvable:$true] %s41_s13 }
  0x26   :  { %p1846_p3 = scmp.lt.u32.totalorder %s1842_s16, %s1976_s2 }
  0x28   :  { %p1848_p4 = pnand %p1846_p3, %p1843_p2 }
  0x2a   :  { %1851 = shalt.err (!%p1848_p4)
}
  0x2b   :  { %s1852_s21 = scalar_lea.vmem %s42_s13, 64  ;;  %p1857_p6 = scmp.lt.s32.totalorder %s42_s13, %s42_s13 }
  0x2c   :  { %p1853_p5 = scmp.ne.s32.totalorder %s42_s13, %s1852_s21  ;;  %p1858_p7 = scmp.lt.s32.totalorder %s1852_s21, %s1852_s21 }
  0x2e   :  { %p1859_p8 = por %p1858_p7, %p1857_p6 }
  0x30   :  { %p1860_p9 = pnand %p1859_p8, %p1853_p5 }
  0x32   :  { %1863 = shalt.err (!%p1860_p9)
}
  0x33   :  { %44 = dma.hbm_to_vmem [thread:$0]  %s1976_s2, 64, %s42_s13, [#allocation6]  }
  0x34   :  { %1886 = dma.done.wait [#allocation3], 2048  }
  0x35   :  { %1887 = vsyncadd [#allocation3], 4294965248 }
  0x36   :  { %1888 = dma.done.wait [#allocation6], 65600  }
  0x37   :  { %1889 = vsyncadd [#allocation6], 4294901696  ;;  %v71_v0 = vld [vmem:[#allocation5 + $0x8] sm:$0xff]  ;;  %v73_v2 = vld [vmem:[#allocation5 + $0x18] sm:$0xff]  ;;  %s1899_s2 = smov [#allocation8]  }
  0x38   :  { %v75_v1 = vld [vmem:[#allocation5 + $0x28] sm:$0xff]  ;;  %v77_v4 = vld [vmem:[#allocation5 + $0x38] sm:$0xff]  ;;  %v70_v5 = vld [vmem:[#allocation5] sm:$0xff]  ;;  %s1233_s25 = sshll.u32 %s1899_s2, 4  ;;  %s1234_s25 = int_to_ptr.vmem [resolvable:$true] %s1233_s25 }
  0x39   :  { %v1246_v3 = vpack.c.bf16 %v75_v1, %v71_v0  ;;  %v74_v6 = vld [vmem:[#allocation5 + $0x20] sm:$0xff]  ;;  %v1502_v7 = vpack.c.bf16 %v77_v4, %v73_v2  ;;  %v72_v9 = vld [vmem:[#allocation5 + $0x10] sm:$0xff]  ;;  %v79_v11 = vld [vmem:[#allocation5 + $0x48] sm:$0xff]  ;;  %s1864_s26 = scalar_lea.vmem %s1234_s25, 1024  ;;  %p1869_p11 = scmp.lt.s32.totalorder %s1234_s25, %s1234_s25 }
  0x3a   :  { %v1248_v8 = vpack.c.bf16 %v74_v6, %v70_v5  ;;  %v76_v10 = vld [vmem:[#allocation5 + $0x30] sm:$0xff]  ;;  %v83_v13 = vld [vmem:[#allocation5 + $0x68] sm:$0xff]  ;;  %v81_v14 = vld [vmem:[#allocation5 + $0x58] sm:$0xff]  ;;  %p1865_p10 = scmp.ne.s32.totalorder %s1234_s25, %s1864_s26  ;;  %p1870_p12 = scmp.lt.s32.totalorder %s1864_s26, %s1864_s26 }
  0x3b   :  { %1247 = vmatprep.subr.bf16.mxu0 %v1246_v3  ;;  %v1504_v12 = vpack.c.bf16 %v76_v10, %v72_v9  ;;  %v85_v15 = vld [vmem:[#allocation5 + $0x78] sm:$0xff]  ;;  %1503 = vmatprep.subr.bf16.mxu1 %v1502_v7  ;;  %v1250_v16 = vpack.c.bf16 %v83_v13, %v79_v11  ;;  %v78_v18 = vld [vmem:[#allocation5 + $0x40] sm:$0xff]  ;;  %v80_v20 = vld [vmem:[#allocation5 + $0x50] sm:$0xff] }
  0x3c   :  { %1249 = vmatpush1.bf16.msra.mxu0 %v1248_v8  ;;  %v1506_v17 = vpack.c.bf16 %v85_v15, %v81_v14  ;;  %v82_v19 = vld [vmem:[#allocation5 + $0x60] sm:$0xff]  ;;  %v84_v22 = vld [vmem:[#allocation5 + $0x70] sm:$0xff]  ;;  %v87_v23 = vld [vmem:[#allocation5 + $0x88] sm:$0xff]  ;;  %p1871_p13 = por %p1870_p12, %p1869_p11 }
  0x3d   :  { %1505 = vmatpush1.bf16.msra.mxu1 %v1504_v12  ;;  %v1252_v21 = vpack.c.bf16 %v82_v19, %v78_v18  ;;  %v91_v24 = vld [vmem:[#allocation5 + $0xa8] sm:$0xff]  ;;  %1251 = vmatprep.subr.bf16.mxu0 %v1250_v16  ;;  %v1508_v25 = vpack.c.bf16 %v84_v22, %v80_v20  ;;  %v89_v27 = vld [vmem:[#allocation5 + $0x98] sm:$0xff]  ;;  %v86_v29 = vld [vmem:[#allocation5 + $0x80] sm:$0xff] }
  0x3e   :  { %1507 = vmatprep.subr.bf16.mxu1 %v1506_v17  ;;  %v1254_v26 = vpack.c.bf16 %v91_v24, %v87_v23  ;;  %v93_v28 = vld [vmem:[#allocation5 + $0xb8] sm:$0xff]  ;;  %v90_v31 = vld [vmem:[#allocation5 + $0xa0] sm:$0xff]  ;;  %v88_v32 = vld [vmem:[#allocation5 + $0x90] sm:$0xff]  ;;  %p1872_p0 = pnand %p1871_p13, %p1865_p10 }
  0x3f   :  { %v1510_v30 = vpack.c.bf16 %v93_v28, %v89_v27  ;;  %v92_v33 = vld [vmem:[#allocation5 + $0xb0] sm:$0xff]  ;;  %v1256_v34 = vpack.c.bf16 %v90_v31, %v86_v29  ;;  %v95_v35 = vld [vmem:[#allocation5 + $0xc8] sm:$0xff]  ;;  %v97_v37 = vld [vmem:[#allocation5 + $0xd8] sm:$0xff] }
  0x40   :  { %1253 = vmatpush1.bf16.msra.mxu0 %v1252_v21  ;;  %v99_v36 = vld [vmem:[#allocation5 + $0xe8] sm:$0xff]  ;;  %v1512_v38 = vpack.c.bf16 %v92_v33, %v88_v32  ;;  %v101_v40 = vld [vmem:[#allocation5 + $0xf8] sm:$0xff]  ;;  %v94_v41 = vld [vmem:[#allocation5 + $0xc0] sm:$0xff] }
  0x41   :  { %1509 = vmatpush1.bf16.msra.mxu1 %v1508_v25  ;;  %1255 = vmatprep.subr.bf16.mxu0 %v1254_v26  ;;  %v1258_v39 = vpack.c.bf16 %v99_v36, %v95_v35  ;;  %v98_v42 = vld [vmem:[#allocation5 + $0xe0] sm:$0xff]  ;;  %v1514_v43 = vpack.c.bf16 %v101_v40, %v97_v37  ;;  %v96_v44 = vld [vmem:[#allocation5 + $0xd0] sm:$0xff]  ;;  %v103_v46 = vld [vmem:[#allocation5 + $0x108] sm:$0xff] }
  0x42   :  { %1511 = vmatprep.subr.bf16.mxu1 %v1510_v30  ;;  %v100_v45 = vld [vmem:[#allocation5 + $0xf0] sm:$0xff]  ;;  %v107_v47 = vld [vmem:[#allocation5 + $0x128] sm:$0xff]  ;;  %v105_v48 = vld [vmem:[#allocation5 + $0x118] sm:$0xff]  ;;  %v1260_v50 = vpack.c.bf16 %v98_v42, %v94_v41 }
  0x43   :  { %v109_v49 = vld [vmem:[#allocation5 + $0x138] sm:$0xff]  ;;  %v1516_v51 = vpack.c.bf16 %v100_v45, %v96_v44  ;;  %v1262_v52 = vpack.c.bf16 %v107_v47, %v103_v46  ;;  %v102_v53 = vld [vmem:[#allocation5 + $0x100] sm:$0xff]  ;;  %v104_v55 = vld [vmem:[#allocation5 + $0x110] sm:$0xff] }
  0x44   :  { %1257 = vmatpush1.bf16.msra.mxu0 %v1256_v34  ;;  %v106_v54 = vld [vmem:[#allocation5 + $0x120] sm:$0xff]  ;;  %v1518_v56 = vpack.c.bf16 %v109_v49, %v105_v48  ;;  %v108_v57 = vld [vmem:[#allocation5 + $0x130] sm:$0xff]  ;;  %v111_v58 = vld [vmem:[#allocation5 + $0x148] sm:$0xff] }
  0x45   :  { %1513 = vmatpush1.bf16.msra.mxu1 %v1512_v38  ;;  %1259 = vmatprep.subr.bf16.mxu0 %v1258_v39  ;;  %v115_v59 = vld [vmem:[#allocation5 + $0x168] sm:$0xff]  ;;  %v113_v60 = vld [vmem:[#allocation5 + $0x158] sm:$0xff]  ;;  %v1264_v62 = vpack.c.bf16 %v106_v54, %v102_v53  ;;  %v1520_v63 = vpack.c.bf16 %v108_v57, %v104_v55  ;;  %v110_v1 = vld [vmem:[#allocation5 + $0x140] sm:$0xff] }
  0x46   :  { %1515 = vmatprep.subr.bf16.mxu1 %v1514_v43  ;;  %v117_v61 = vld [vmem:[#allocation5 + $0x178] sm:$0xff]  ;;  %v1266_v0 = vpack.c.bf16 %v115_v59, %v111_v58  ;;  %v114_v2 = vld [vmem:[#allocation5 + $0x160] sm:$0xff]  ;;  %v112_v3 = vld [vmem:[#allocation5 + $0x150] sm:$0xff] }
  0x47   :  { %v1522_v4 = vpack.c.bf16 %v117_v61, %v113_v60  ;;  %v116_v5 = vld [vmem:[#allocation5 + $0x170] sm:$0xff]  ;;  %v119_v6 = vld [vmem:[#allocation5 + $0x188] sm:$0xff]  ;;  %v121_v8 = vld [vmem:[#allocation5 + $0x198] sm:$0xff]  ;;  %v1268_v10 = vpack.c.bf16 %v114_v2, %v110_v1 }
  0x48   :  { %1261 = vmatpush1.bf16.msra.mxu0 %v1260_v50  ;;  %v123_v7 = vld [vmem:[#allocation5 + $0x1a8] sm:$0xff]  ;;  %v125_v9 = vld [vmem:[#allocation5 + $0x1b8] sm:$0xff]  ;;  %v1524_v11 = vpack.c.bf16 %v116_v5, %v112_v3  ;;  %v118_v13 = vld [vmem:[#allocation5 + $0x180] sm:$0xff] }
  0x49   :  { %1517 = vmatpush1.bf16.msra.mxu1 %v1516_v51  ;;  %1263 = vmatprep.subr.bf16.mxu0 %v1262_v52  ;;  %v1270_v12 = vpack.c.bf16 %v123_v7, %v119_v6  ;;  %v122_v14 = vld [vmem:[#allocation5 + $0x1a0] sm:$0xff]  ;;  %v120_v15 = vld [vmem:[#allocation5 + $0x190] sm:$0xff]  ;;  %v1526_v16 = vpack.c.bf16 %v125_v9, %v121_v8  ;;  %v127_v18 = vld [vmem:[#allocation5 + $0x1c8] sm:$0xff] }
  0x4a   :  { %1519 = vmatprep.subr.bf16.mxu1 %v1518_v56  ;;  %v124_v17 = vld [vmem:[#allocation5 + $0x1b0] sm:$0xff]  ;;  %v131_v19 = vld [vmem:[#allocation5 + $0x1e8] sm:$0xff]  ;;  %v129_v20 = vld [vmem:[#allocation5 + $0x1d8] sm:$0xff]  ;;  %v1272_v22 = vpack.c.bf16 %v122_v14, %v118_v13 }
  0x4b   :  { %v133_v21 = vld [vmem:[#allocation5 + $0x1f8] sm:$0xff]  ;;  %v1528_v23 = vpack.c.bf16 %v124_v17, %v120_v15  ;;  %v1274_v24 = vpack.c.bf16 %v131_v19, %v127_v18  ;;  %v126_v25 = vld [vmem:[#allocation5 + $0x1c0] sm:$0xff]  ;;  %v128_v27 = vld [vmem:[#allocation5 + $0x1d0] sm:$0xff] }
  0x4c   :  { %1265 = vmatpush1.bf16.msra.mxu0 %v1264_v62  ;;  %v130_v26 = vld [vmem:[#allocation5 + $0x1e0] sm:$0xff]  ;;  %v1530_v28 = vpack.c.bf16 %v133_v21, %v129_v20  ;;  %v132_v29 = vld [vmem:[#allocation5 + $0x1f0] sm:$0xff]  ;;  %v135_v30 = vld [vmem:[#allocation5 + $0x208] sm:$0xff] }
  0x4d   :  { %1521 = vmatpush1.bf16.msra.mxu1 %v1520_v63  ;;  %1267 = vmatprep.subr.bf16.mxu0 %v1266_v0  ;;  %v139_v31 = vld [vmem:[#allocation5 + $0x228] sm:$0xff]  ;;  %v137_v32 = vld [vmem:[#allocation5 + $0x218] sm:$0xff]  ;;  %v1276_v34 = vpack.c.bf16 %v130_v26, %v126_v25  ;;  %v1532_v35 = vpack.c.bf16 %v132_v29, %v128_v27  ;;  %v134_v37 = vld [vmem:[#allocation5 + $0x200] sm:$0xff] }
  0x4e   :  { %1523 = vmatprep.subr.bf16.mxu1 %v1522_v4  ;;  %v141_v33 = vld [vmem:[#allocation5 + $0x238] sm:$0xff]  ;;  %v1278_v36 = vpack.c.bf16 %v139_v31, %v135_v30  ;;  %v138_v38 = vld [vmem:[#allocation5 + $0x220] sm:$0xff]  ;;  %v136_v39 = vld [vmem:[#allocation5 + $0x210] sm:$0xff] }
  0x4f   :  { %v1534_v40 = vpack.c.bf16 %v141_v33, %v137_v32  ;;  %v140_v41 = vld [vmem:[#allocation5 + $0x230] sm:$0xff]  ;;  %v143_v42 = vld [vmem:[#allocation5 + $0x248] sm:$0xff]  ;;  %v145_v44 = vld [vmem:[#allocation5 + $0x258] sm:$0xff]  ;;  %v1280_v46 = vpack.c.bf16 %v138_v38, %v134_v37 }
  0x50   :  { %1269 = vmatpush1.bf16.msra.mxu0 %v1268_v10  ;;  %v147_v43 = vld [vmem:[#allocation5 + $0x268] sm:$0xff]  ;;  %v149_v45 = vld [vmem:[#allocation5 + $0x278] sm:$0xff]  ;;  %v1536_v47 = vpack.c.bf16 %v140_v41, %v136_v39  ;;  %v142_v49 = vld [vmem:[#allocation5 + $0x240] sm:$0xff] }
  0x51   :  { %1525 = vmatpush1.bf16.msra.mxu1 %v1524_v11  ;;  %1271 = vmatprep.subr.bf16.mxu0 %v1270_v12  ;;  %v1282_v48 = vpack.c.bf16 %v147_v43, %v143_v42  ;;  %v146_v50 = vld [vmem:[#allocation5 + $0x260] sm:$0xff]  ;;  %v144_v51 = vld [vmem:[#allocation5 + $0x250] sm:$0xff]  ;;  %v1538_v52 = vpack.c.bf16 %v149_v45, %v145_v44  ;;  %v151_v54 = vld [vmem:[#allocation5 + $0x288] sm:$0xff] }
  0x52   :  { %1527 = vmatprep.subr.bf16.mxu1 %v1526_v16  ;;  %v148_v53 = vld [vmem:[#allocation5 + $0x270] sm:$0xff]  ;;  %v155_v55 = vld [vmem:[#allocation5 + $0x2a8] sm:$0xff]  ;;  %v153_v56 = vld [vmem:[#allocation5 + $0x298] sm:$0xff]  ;;  %v1284_v58 = vpack.c.bf16 %v146_v50, %v142_v49 }
  0x53   :  { %v157_v57 = vld [vmem:[#allocation5 + $0x2b8] sm:$0xff]  ;;  %v1540_v59 = vpack.c.bf16 %v148_v53, %v144_v51  ;;  %v1286_v60 = vpack.c.bf16 %v155_v55, %v151_v54  ;;  %v150_v61 = vld [vmem:[#allocation5 + $0x280] sm:$0xff]  ;;  %v152_v63 = vld [vmem:[#allocation5 + $0x290] sm:$0xff] }
  0x54   :  { %1273 = vmatpush1.bf16.msra.mxu0 %v1272_v22  ;;  %v154_v62 = vld [vmem:[#allocation5 + $0x2a0] sm:$0xff]  ;;  %v1542_v0 = vpack.c.bf16 %v157_v57, %v153_v56  ;;  %v156_v1 = vld [vmem:[#allocation5 + $0x2b0] sm:$0xff]  ;;  %v159_v2 = vld [vmem:[#allocation5 + $0x2c8] sm:$0xff] }
  0x55   :  { %1529 = vmatpush1.bf16.msra.mxu1 %v1528_v23  ;;  %1275 = vmatprep.subr.bf16.mxu0 %v1274_v24  ;;  %v163_v3 = vld [vmem:[#allocation5 + $0x2e8] sm:$0xff]  ;;  %v161_v4 = vld [vmem:[#allocation5 + $0x2d8] sm:$0xff]  ;;  %v1288_v6 = vpack.c.bf16 %v154_v62, %v150_v61  ;;  %v158_v7 = vld [vmem:[#allocation5 + $0x2c0] sm:$0xff]  ;;  %v1544_v8 = vpack.c.bf16 %v156_v1, %v152_v63 }
  0x56   :  { %1531 = vmatprep.subr.bf16.mxu1 %v1530_v28  ;;  %v165_v5 = vld [vmem:[#allocation5 + $0x2f8] sm:$0xff]  ;;  %v1290_v9 = vpack.c.bf16 %v163_v3, %v159_v2  ;;  %v162_v10 = vld [vmem:[#allocation5 + $0x2e0] sm:$0xff]  ;;  %v160_v11 = vld [vmem:[#allocation5 + $0x2d0] sm:$0xff] }
  0x57   :  { %v164_v12 = vld [vmem:[#allocation5 + $0x2f0] sm:$0xff]  ;;  %v1546_v13 = vpack.c.bf16 %v165_v5, %v161_v4  ;;  %v167_v14 = vld [vmem:[#allocation5 + $0x308] sm:$0xff]  ;;  %v169_v17 = vld [vmem:[#allocation5 + $0x318] sm:$0xff]  ;;  %v1292_v19 = vpack.c.bf16 %v162_v10, %v158_v7 }
  0x58   :  { %1277 = vmatpush1.bf16.msra.mxu0 %v1276_v34  ;;  %v171_v15 = vld [vmem:[#allocation5 + $0x328] sm:$0xff]  ;;  %v173_v18 = vld [vmem:[#allocation5 + $0x338] sm:$0xff]  ;;  %v1548_v20 = vpack.c.bf16 %v164_v12, %v160_v11  ;;  %v166_v22 = vld [vmem:[#allocation5 + $0x300] sm:$0xff] }
  0x59   :  { %1533 = vmatpush1.bf16.msra.mxu1 %v1532_v35  ;;  %1279 = vmatprep.subr.bf16.mxu0 %v1278_v36  ;;  %v55_v16 = vld [vmem:[#allocation2 + $0x8] sm:$0xff]  ;;  %v1294_v21 = vpack.c.bf16 %v171_v15, %v167_v14  ;;  %v170_v23 = vld [vmem:[#allocation5 + $0x320] sm:$0xff]  ;;  %v168_v24 = vld [vmem:[#allocation5 + $0x310] sm:$0xff]  ;;  %v1550_v25 = vpack.c.bf16 %v173_v18, %v169_v17 }
  0x5a   :  { %1535 = vmatprep.subr.bf16.mxu1 %v1534_v40  ;;  %668 = vmatprep.mubr.f32.mxu0 %v55_v16  ;;  %v172_v26 = vld [vmem:[#allocation5 + $0x330] sm:$0xff]  ;;  %v175_v27 = vld [vmem:[#allocation5 + $0x348] sm:$0xff]  ;;  %v177_v29 = vld [vmem:[#allocation5 + $0x358] sm:$0xff]  ;;  %v1296_v31 = vpack.c.bf16 %v170_v23, %v166_v22 }
  0x5b   :  { %976 = vmatprep.mubr.f32.mxu1 %v55_v16  ;;  %v179_v28 = vld [vmem:[#allocation5 + $0x368] sm:$0xff]  ;;  %v181_v30 = vld [vmem:[#allocation5 + $0x378] sm:$0xff]  ;;  %v1552_v32 = vpack.c.bf16 %v172_v26, %v168_v24  ;;  %v174_v34 = vld [vmem:[#allocation5 + $0x340] sm:$0xff] }
  0x5c   :  { %1281 = vmatpush1.bf16.msra.mxu0 %v1280_v46  ;;  %v1298_v33 = vpack.c.bf16 %v179_v28, %v175_v27  ;;  %v178_v35 = vld [vmem:[#allocation5 + $0x360] sm:$0xff]  ;;  %v176_v36 = vld [vmem:[#allocation5 + $0x350] sm:$0xff]  ;;  %v1554_v37 = vpack.c.bf16 %v181_v30, %v177_v29  ;;  %v183_v39 = vld [vmem:[#allocation5 + $0x388] sm:$0xff] }
  0x5d   :  { %1537 = vmatpush1.bf16.msra.mxu1 %v1536_v47  ;;  %1283 = vmatprep.subr.bf16.mxu0 %v1282_v48  ;;  %v180_v38 = vld [vmem:[#allocation5 + $0x370] sm:$0xff]  ;;  %v187_v40 = vld [vmem:[#allocation5 + $0x3a8] sm:$0xff]  ;;  %v185_v41 = vld [vmem:[#allocation5 + $0x398] sm:$0xff]  ;;  %v1300_v43 = vpack.c.bf16 %v178_v35, %v174_v34 }
  0x5e   :  { %1539 = vmatprep.subr.bf16.mxu1 %v1538_v52  ;;  %v189_v42 = vld [vmem:[#allocation5 + $0x3b8] sm:$0xff]  ;;  %v1556_v44 = vpack.c.bf16 %v180_v38, %v176_v36  ;;  %v1302_v45 = vpack.c.bf16 %v187_v40, %v183_v39  ;;  %v182_v46 = vld [vmem:[#allocation5 + $0x380] sm:$0xff]  ;;  %v184_v48 = vld [vmem:[#allocation5 + $0x390] sm:$0xff] }
  0x5f   :  { %v186_v47 = vld [vmem:[#allocation5 + $0x3a0] sm:$0xff]  ;;  %v1558_v49 = vpack.c.bf16 %v189_v42, %v185_v41  ;;  %v188_v50 = vld [vmem:[#allocation5 + $0x3b0] sm:$0xff]  ;;  %v191_v51 = vld [vmem:[#allocation5 + $0x3c8] sm:$0xff] }
  0x60   :  { %1285 = vmatpush1.bf16.msra.mxu0 %v1284_v58  ;;  %v195_v52 = vld [vmem:[#allocation5 + $0x3e8] sm:$0xff]  ;;  %v193_v53 = vld [vmem:[#allocation5 + $0x3d8] sm:$0xff]  ;;  %v1304_v55 = vpack.c.bf16 %v186_v47, %v182_v46  ;;  %v1560_v56 = vpack.c.bf16 %v188_v50, %v184_v48  ;;  %v190_v58 = vld [vmem:[#allocation5 + $0x3c0] sm:$0xff] }
  0x61   :  { %1541 = vmatpush1.bf16.msra.mxu1 %v1540_v59  ;;  %1287 = vmatprep.subr.bf16.mxu0 %v1286_v60  ;;  %v197_v54 = vld [vmem:[#allocation5 + $0x3f8] sm:$0xff]  ;;  %v1306_v57 = vpack.c.bf16 %v195_v52, %v191_v51  ;;  %v194_v59 = vld [vmem:[#allocation5 + $0x3e0] sm:$0xff]  ;;  %v192_v60 = vld [vmem:[#allocation5 + $0x3d0] sm:$0xff] }
  0x62   :  { %1543 = vmatprep.subr.bf16.mxu1 %v1542_v0  ;;  %v1562_v61 = vpack.c.bf16 %v197_v54, %v193_v53  ;;  %v196_v62 = vld [vmem:[#allocation5 + $0x3f0] sm:$0xff]  ;;  %v199_v63 = vld [vmem:[#allocation5 + $0x408] sm:$0xff]  ;;  %v201_v1 = vld [vmem:[#allocation5 + $0x418] sm:$0xff]  ;;  %v1308_v3 = vpack.c.bf16 %v194_v59, %v190_v58 }
  0x63   :  { %v203_v0 = vld [vmem:[#allocation5 + $0x428] sm:$0xff]  ;;  %v205_v2 = vld [vmem:[#allocation5 + $0x438] sm:$0xff]  ;;  %v1564_v4 = vpack.c.bf16 %v196_v62, %v192_v60  ;;  %v202_v7 = vld [vmem:[#allocation5 + $0x420] sm:$0xff] }
  0x64   :  { %1289 = vmatpush1.bf16.msra.mxu0 %v1288_v6  ;;  %v1310_v5 = vpack.c.bf16 %v203_v0, %v199_v63  ;;  %v198_v6 = vld [vmem:[#allocation5 + $0x400] sm:$0xff]  ;;  %v204_v10 = vld [vmem:[#allocation5 + $0x430] sm:$0xff]  ;;  %v207_v11 = vld [vmem:[#allocation5 + $0x448] sm:$0xff] }
  0x65   :  { %1545 = vmatpush1.bf16.msra.mxu1 %v1544_v8  ;;  %1291 = vmatprep.subr.bf16.mxu0 %v1290_v9  ;;  %v200_v8 = vld [vmem:[#allocation5 + $0x410] sm:$0xff]  ;;  %v1566_v9 = vpack.c.bf16 %v205_v2, %v201_v1  ;;  %v211_v12 = vld [vmem:[#allocation5 + $0x468] sm:$0xff]  ;;  %v213_v14 = vld [vmem:[#allocation5 + $0x478] sm:$0xff]  ;;  %v1312_v16 = vpack.c.bf16 %v202_v7, %v198_v6 }
  0x66   :  { %1547 = vmatprep.subr.bf16.mxu1 %v1546_v13  ;;  %v209_v13 = vld [vmem:[#allocation5 + $0x458] sm:$0xff]  ;;  %v54_v15 = vld [vmem:[#allocation2] sm:$0xff]  ;;  %v1568_v17 = vpack.c.bf16 %v204_v10, %v200_v8  ;;  %v1314_v18 = vpack.c.bf16 %v211_v12, %v207_v11  ;;  %v212_v23 = vld [vmem:[#allocation5 + $0x470] sm:$0xff] }
  0x67   :  { %v1570_v22 = vpack.c.bf16 %v213_v14, %v209_v13  ;;  %v215_v24 = vld [vmem:[#allocation5 + $0x488] sm:$0xff]  ;;  %v217_v26 = vld [vmem:[#allocation5 + $0x498] sm:$0xff]  ;;  %v220_v35 = vld [vmem:[#allocation5 + $0x4b0] sm:$0xff] }
  0x68   :  { %1293 = vmatpush1.bf16.msra.mxu0 %v1292_v19  ;;  %v206_v19 = vld [vmem:[#allocation5 + $0x440] sm:$0xff]  ;;  %v221_v27 = vld [vmem:[#allocation5 + $0x4b8] sm:$0xff]  ;;  %v223_v36 = vld [vmem:[#allocation5 + $0x4c8] sm:$0xff] }
  0x69   :  { %1549 = vmatpush1.bf16.msra.mxu1 %v1548_v20  ;;  %1295 = vmatprep.subr.bf16.mxu0 %v1294_v21  ;;  %v210_v20 = vld [vmem:[#allocation5 + $0x460] sm:$0xff]  ;;  %v208_v21 = vld [vmem:[#allocation5 + $0x450] sm:$0xff]  ;;  %v1574_v34 = vpack.c.bf16 %v221_v27, %v217_v26  ;;  %v225_v38 = vld [vmem:[#allocation5 + $0x4d8] sm:$0xff] }
  0x6a   :  { %1551 = vmatprep.subr.bf16.mxu1 %v1550_v25  ;;  %v219_v25 = vld [vmem:[#allocation5 + $0x4a8] sm:$0xff]  ;;  %v1316_v28 = vpack.c.bf16 %v210_v20, %v206_v19  ;;  %v1572_v29 = vpack.c.bf16 %v212_v23, %v208_v21  ;;  %v229_v39 = vld [vmem:[#allocation5 + $0x4f8] sm:$0xff]  ;;  %v228_v47 = vld [vmem:[#allocation5 + $0x4f0] sm:$0xff] }
  0x6b   :  { %v1318_v30 = vpack.c.bf16 %v219_v25, %v215_v24  ;;  %v1578_v46 = vpack.c.bf16 %v229_v39, %v225_v38  ;;  %v231_v48 = vld [vmem:[#allocation5 + $0x508] sm:$0xff]  ;;  %v233_v50 = vld [vmem:[#allocation5 + $0x518] sm:$0xff]  ;;  %v236_v59 = vld [vmem:[#allocation5 + $0x530] sm:$0xff] }
  0x6c   :  { %1297 = vmatpush1.bf16.msra.mxu0 %v1296_v31  ;;  %v214_v31 = vld [vmem:[#allocation5 + $0x480] sm:$0xff]  ;;  %v237_v51 = vld [vmem:[#allocation5 + $0x538] sm:$0xff]  ;;  %v239_v60 = vld [vmem:[#allocation5 + $0x548] sm:$0xff] }
  0x6d   :  { %1553 = vmatpush1.bf16.msra.mxu1 %v1552_v32  ;;  %1299 = vmatprep.subr.bf16.mxu0 %v1298_v33  ;;  %v218_v32 = vld [vmem:[#allocation5 + $0x4a0] sm:$0xff]  ;;  %v216_v33 = vld [vmem:[#allocation5 + $0x490] sm:$0xff]  ;;  %v1582_v58 = vpack.c.bf16 %v237_v51, %v233_v50  ;;  %v241_v62 = vld [vmem:[#allocation5 + $0x558] sm:$0xff] }
  0x6e   :  { %1555 = vmatprep.subr.bf16.mxu1 %v1554_v37  ;;  %v227_v37 = vld [vmem:[#allocation5 + $0x4e8] sm:$0xff]  ;;  %v1320_v40 = vpack.c.bf16 %v218_v32, %v214_v31  ;;  %v1576_v41 = vpack.c.bf16 %v220_v35, %v216_v33  ;;  %v245_v63 = vld [vmem:[#allocation5 + $0x578] sm:$0xff]  ;;  %v244_v7 = vld [vmem:[#allocation5 + $0x570] sm:$0xff] }
  0x6f   :  { %v1322_v42 = vpack.c.bf16 %v227_v37, %v223_v36  ;;  %v1586_v6 = vpack.c.bf16 %v245_v63, %v241_v62  ;;  %v247_v8 = vld [vmem:[#allocation5 + $0x588] sm:$0xff]  ;;  %v249_v10 = vld [vmem:[#allocation5 + $0x598] sm:$0xff]  ;;  %v246_v14 = vld [vmem:[#allocation5 + $0x580] sm:$0xff] }
  0x70   :  { %1301 = vmatpush1.bf16.msra.mxu0 %v1300_v43  ;;  %v222_v43 = vld [vmem:[#allocation5 + $0x4c0] sm:$0xff]  ;;  %v253_v11 = vld [vmem:[#allocation5 + $0x5b8] sm:$0xff]  ;;  %v63_v12 = vld [vmem:[#allocation2 + $0x48] sm:$0xff] }
  0x71   :  { %1557 = vmatpush1.bf16.msra.mxu1 %v1556_v44  ;;  %1303 = vmatprep.subr.bf16.mxu0 %v1302_v45  ;;  %v226_v44 = vld [vmem:[#allocation5 + $0x4e0] sm:$0xff]  ;;  %v224_v45 = vld [vmem:[#allocation5 + $0x4d0] sm:$0xff]  ;;  %v1590_v21 = vpack.c.bf16 %v253_v11, %v249_v10  ;;  %v259_v23 = vld [vmem:[#allocation5 + $0x5e8] sm:$0xff] }
  0x72   :  { %1559 = vmatprep.subr.bf16.mxu1 %v1558_v49  ;;  %v235_v49 = vld [vmem:[#allocation5 + $0x528] sm:$0xff]  ;;  %v1324_v52 = vpack.c.bf16 %v226_v44, %v222_v43  ;;  %v1580_v53 = vpack.c.bf16 %v228_v47, %v224_v45  ;;  %v252_v19 = vld [vmem:[#allocation5 + $0x5b0] sm:$0xff]  ;;  %v62_v20 = vld [vmem:[#allocation2 + $0x40] sm:$0xff] }
  0x73   :  { %v1326_v54 = vpack.c.bf16 %v235_v49, %v231_v48  ;;  %v57_v24 = vld [vmem:[#allocation2 + $0x18] sm:$0xff]  ;;  %v258_v31 = vld [vmem:[#allocation5 + $0x5e0] sm:$0xff]  ;;  %v256_v32 = vld [vmem:[#allocation5 + $0x5d0] sm:$0xff] }
  0x74   :  { %1305 = vmatpush1.bf16.msra.mxu0 %v1304_v55  ;;  %v230_v55 = vld [vmem:[#allocation5 + $0x500] sm:$0xff]  ;;  %v257_v25 = vld [vmem:[#allocation5 + $0x5d8] sm:$0xff]  ;;  %v263_v35 = vld [vmem:[#allocation5 + $0x608] sm:$0xff] }
  0x75   :  { %1561 = vmatpush1.bf16.msra.mxu1 %v1560_v56  ;;  %1307 = vmatprep.subr.bf16.mxu0 %v1306_v57  ;;  %v234_v56 = vld [vmem:[#allocation5 + $0x520] sm:$0xff]  ;;  %v232_v57 = vld [vmem:[#allocation5 + $0x510] sm:$0xff]  ;;  %v261_v26 = vld [vmem:[#allocation5 + $0x5f8] sm:$0xff] }
  0x76   :  { %1563 = vmatprep.subr.bf16.mxu1 %v1562_v61  ;;  %v243_v61 = vld [vmem:[#allocation5 + $0x568] sm:$0xff]  ;;  %v1328_v0 = vpack.c.bf16 %v234_v56, %v230_v55  ;;  %v1584_v1 = vpack.c.bf16 %v236_v59, %v232_v57  ;;  %v1594_v33 = vpack.c.bf16 %v261_v26, %v257_v25  ;;  %v265_v37 = vld [vmem:[#allocation5 + $0x618] sm:$0xff]  ;;  %v266_v43 = vld [vmem:[#allocation5 + $0x620] sm:$0xff] }
  0x77   :  { %v1330_v2 = vpack.c.bf16 %v243_v61, %v239_v60  ;;  %v267_v36 = vld [vmem:[#allocation5 + $0x628] sm:$0xff]  ;;  %v269_v38 = vld [vmem:[#allocation5 + $0x638] sm:$0xff]  ;;  %v264_v44 = vld [vmem:[#allocation5 + $0x610] sm:$0xff] }
  0x78   :  { %1309 = vmatpush1.bf16.msra.mxu0 %v1308_v3  ;;  %v238_v3 = vld [vmem:[#allocation5 + $0x540] sm:$0xff]  ;;  %v1598_v45 = vpack.c.bf16 %v269_v38, %v265_v37  ;;  %v271_v47 = vld [vmem:[#allocation5 + $0x648] sm:$0xff]  ;;  %v273_v49 = vld [vmem:[#allocation5 + $0x658] sm:$0xff] }
  0x79   :  { %1565 = vmatpush1.bf16.msra.mxu1 %v1564_v4  ;;  %1311 = vmatprep.subr.bf16.mxu0 %v1310_v5  ;;  %v242_v4 = vld [vmem:[#allocation5 + $0x560] sm:$0xff]  ;;  %v240_v5 = vld [vmem:[#allocation5 + $0x550] sm:$0xff]  ;;  %v275_v48 = vld [vmem:[#allocation5 + $0x668] sm:$0xff] }
  0x7a   :  { %1567 = vmatprep.subr.bf16.mxu1 %v1566_v9  ;;  %v251_v9 = vld [vmem:[#allocation5 + $0x5a8] sm:$0xff]  ;;  %v1332_v13 = vpack.c.bf16 %v242_v4, %v238_v3  ;;  %v277_v50 = vld [vmem:[#allocation5 + $0x678] sm:$0xff]  ;;  %v274_v55 = vld [vmem:[#allocation5 + $0x660] sm:$0xff] }
  0x7b   :  { %669 = vmatmul.mubr.f32.vlgmr.msra.gmra.mrb[0].mxu0 %v54_v15  ;;  %v272_v56 = vld [vmem:[#allocation5 + $0x650] sm:$0xff]  ;;  %v1602_v57 = vpack.c.bf16 %v277_v50, %v273_v49  ;;  %v279_v59 = vld [vmem:[#allocation5 + $0x688] sm:$0xff]  ;;  %v281_v61 = vld [vmem:[#allocation5 + $0x698] sm:$0xff] }
  0x7c   :  { %1313 = vmatpush1.bf16.msra.mxu0 %v1312_v16  ;;  %977 = vmatmul.mubr.f32.vlgmr.msra.gmra.mrb[0].mxu1 %v54_v15  ;;  %v250_v15 = vld [vmem:[#allocation5 + $0x5a0] sm:$0xff]  ;;  %v1588_v16 = vpack.c.bf16 %v244_v7, %v240_v5  ;;  %v283_v60 = vld [vmem:[#allocation5 + $0x6a8] sm:$0xff]  ;;  %v285_v62 = vld [vmem:[#allocation5 + $0x6b8] sm:$0xff] }
  0x7d   :  { %1569 = vmatpush1.bf16.msra.mxu1 %v1568_v17  ;;  %1315 = vmatprep.subr.bf16.mxu0 %v1314_v18  ;;  %v1334_v17 = vpack.c.bf16 %v251_v9, %v247_v8  ;;  %v248_v18 = vld [vmem:[#allocation5 + $0x590] sm:$0xff]  ;;  %v1336_v27 = vpack.c.bf16 %v250_v15, %v246_v14  ;;  %v282_v3 = vld [vmem:[#allocation5 + $0x6a0] sm:$0xff]  ;;  %v1606_v5 = vpack.c.bf16 %v285_v62, %v281_v61  ;;  %v287_v7 = vld [vmem:[#allocation5 + $0x6c8] sm:$0xff] }
  0x7e   :  { %1571 = vmatprep.subr.bf16.mxu1 %v1570_v22  ;;  %674 = vmatprep.mubr.f32.mxu0 %v63_v12  ;;  %v255_v22 = vld [vmem:[#allocation5 + $0x5c8] sm:$0xff]  ;;  %v280_v4 = vld [vmem:[#allocation5 + $0x690] sm:$0xff]  ;;  %v289_v9 = vld [vmem:[#allocation5 + $0x6d8] sm:$0xff] }
  0x7f   :  { %982 = vmatprep.mubr.f32.mxu1 %v63_v12  ;;  %675 = vmatmul.mubr.f32.gmra.mrb[2].mxu0 %v62_v20  ;;  %v291_v8 = vld [vmem:[#allocation5 + $0x6e8] sm:$0xff]  ;;  %v293_v10 = vld [vmem:[#allocation5 + $0x6f8] sm:$0xff]  ;;  %v286_v14 = vld [vmem:[#allocation5 + $0x6c0] sm:$0xff] }
  0x80   :  { %1317 = vmatpush1.bf16.msra.mxu0 %v1316_v28  ;;  %983 = vmatmul.mubr.f32.gmra.mrb[2].mxu1 %v62_v20  ;;  %v1592_v28 = vpack.c.bf16 %v252_v19, %v248_v18  ;;  %v290_v15 = vld [vmem:[#allocation5 + $0x6e0] sm:$0xff]  ;;  %v292_v18 = vld [vmem:[#allocation5 + $0x6f0] sm:$0xff]  ;;  %v295_v19 = vld [vmem:[#allocation5 + $0x708] sm:$0xff] }
  0x81   :  { %1573 = vmatpush1.bf16.msra.mxu1 %v1572_v29  ;;  %1319 = vmatprep.subr.bf16.mxu0 %v1318_v30  ;;  %v1338_v29 = vpack.c.bf16 %v259_v23, %v255_v22  ;;  %v254_v30 = vld [vmem:[#allocation5 + $0x5c0] sm:$0xff]  ;;  %v299_v20 = vld [vmem:[#allocation5 + $0x728] sm:$0xff]  ;;  %v301_v22 = vld [vmem:[#allocation5 + $0x738] sm:$0xff]  ;;  %v1356_v23 = vpack.c.bf16 %v290_v15, %v286_v14 }
  0x82   :  { %1575 = vmatprep.subr.bf16.mxu1 %v1574_v34  ;;  %745 = vmatprep.mubr.f32.mxu0 %v57_v24  ;;  %v260_v34 = vld [vmem:[#allocation5 + $0x5f0] sm:$0xff]  ;;  %v1340_v39 = vpack.c.bf16 %v258_v31, %v254_v30  ;;  %v1358_v25 = vpack.c.bf16 %v299_v20, %v295_v19  ;;  %v294_v26 = vld [vmem:[#allocation5 + $0x700] sm:$0xff]  ;;  %v303_v31 = vld [vmem:[#allocation5 + $0x748] sm:$0xff] }
  0x83   :  { %1053 = vmatprep.mubr.f32.mxu1 %v57_v24  ;;  %v300_v30 = vld [vmem:[#allocation5 + $0x730] sm:$0xff]  ;;  %v302_v38 = vld [vmem:[#allocation5 + $0x740] sm:$0xff]  ;;  %v335_v15 = vld [vmem:[#allocation5 + $0x848] sm:$0xff] }
  0x84   :  { %1321 = vmatpush1.bf16.msra.mxu0 %v1320_v40  ;;  %v1596_v40 = vpack.c.bf16 %v260_v34, %v256_v32  ;;  %v307_v32 = vld [vmem:[#allocation5 + $0x768] sm:$0xff]  ;;  %v309_v34 = vld [vmem:[#allocation5 + $0x778] sm:$0xff]  ;;  %v310_v50 = vld [vmem:[#allocation5 + $0x780] sm:$0xff] }
  0x85   :  { %1577 = vmatpush1.bf16.msra.mxu1 %v1576_v41  ;;  %1323 = vmatprep.subr.bf16.mxu0 %v1322_v42  ;;  %v1342_v41 = vpack.c.bf16 %v267_v36, %v263_v35  ;;  %v262_v42 = vld [vmem:[#allocation5 + $0x600] sm:$0xff]  ;;  %v1362_v37 = vpack.c.bf16 %v307_v32, %v303_v31  ;;  %v332_v14 = vld [vmem:[#allocation5 + $0x830] sm:$0xff]  ;;  %v349_v31 = vld [vmem:[#allocation5 + $0x8b8] sm:$0xff] }
  0x86   :  { %1579 = vmatprep.subr.bf16.mxu1 %v1578_v46  ;;  %v268_v46 = vld [vmem:[#allocation5 + $0x630] sm:$0xff]  ;;  %v1344_v51 = vpack.c.bf16 %v266_v43, %v262_v42  ;;  %v311_v43 = vld [vmem:[#allocation5 + $0x788] sm:$0xff]  ;;  %v318_v62 = vld [vmem:[#allocation5 + $0x7c0] sm:$0xff] }
  0x87   :  { %v308_v42 = vld [vmem:[#allocation5 + $0x770] sm:$0xff]  ;;  %v65_v32 = vld [vmem:[#allocation2 + $0x58] sm:$0xff] }
  0x88   :  { %1325 = vmatpush1.bf16.msra.mxu0 %v1324_v52  ;;  %v1600_v52 = vpack.c.bf16 %v268_v46, %v264_v44  ;;  %v315_v44 = vld [vmem:[#allocation5 + $0x7a8] sm:$0xff]  ;;  %v317_v46 = vld [vmem:[#allocation5 + $0x7b8] sm:$0xff]  ;;  %v56_v19 = vld [vmem:[#allocation2 + $0x10] sm:$0xff] }
  0x89   :  { %1581 = vmatpush1.bf16.msra.mxu1 %v1580_v53  ;;  %1327 = vmatprep.subr.bf16.mxu0 %v1326_v54  ;;  %v1346_v53 = vpack.c.bf16 %v275_v48, %v271_v47  ;;  %v270_v54 = vld [vmem:[#allocation5 + $0x640] sm:$0xff]  ;;  %v1366_v49 = vpack.c.bf16 %v315_v44, %v311_v43  ;;  %v355_v43 = vld [vmem:[#allocation5 + $0x8e8] sm:$0xff]  ;;  %v353_v44 = vld [vmem:[#allocation5 + $0x8d8] sm:$0xff] }
  0x8a   :  { %1583 = vmatprep.subr.bf16.mxu1 %v1582_v58  ;;  %v276_v58 = vld [vmem:[#allocation5 + $0x670] sm:$0xff]  ;;  %v1348_v63 = vpack.c.bf16 %v274_v55, %v270_v54  ;;  %v319_v55 = vld [vmem:[#allocation5 + $0x7c8] sm:$0xff] }
  0x8b   :  { %v316_v54 = vld [vmem:[#allocation5 + $0x7b0] sm:$0xff] }
  0x8c   :  { %1329 = vmatpush1.bf16.msra.mxu0 %v1328_v0  ;;  %v1604_v0 = vpack.c.bf16 %v276_v58, %v272_v56  ;;  %v323_v56 = vld [vmem:[#allocation5 + $0x7e8] sm:$0xff]  ;;  %v325_v58 = vld [vmem:[#allocation5 + $0x7f8] sm:$0xff] }
  0x8d   :  { %1585 = vmatpush1.bf16.msra.mxu1 %v1584_v1  ;;  %1331 = vmatprep.subr.bf16.mxu0 %v1330_v2  ;;  %v1350_v1 = vpack.c.bf16 %v283_v60, %v279_v59  ;;  %v278_v2 = vld [vmem:[#allocation5 + $0x680] sm:$0xff]  ;;  %v1370_v61 = vpack.c.bf16 %v323_v56, %v319_v55  ;;  %v359_v55 = vld [vmem:[#allocation5 + $0x908] sm:$0xff] }
  0x8e   :  { %1587 = vmatprep.subr.bf16.mxu1 %v1586_v6  ;;  %v284_v6 = vld [vmem:[#allocation5 + $0x6b0] sm:$0xff]  ;;  %v1352_v11 = vpack.c.bf16 %v282_v3, %v278_v2  ;;  %v327_v3 = vld [vmem:[#allocation5 + $0x808] sm:$0xff] }
  0x8f   :  { %v1608_v12 = vpack.c.bf16 %v284_v6, %v280_v4  ;;  %v324_v2 = vld [vmem:[#allocation5 + $0x7f0] sm:$0xff]  ;;  %v331_v4 = vld [vmem:[#allocation5 + $0x828] sm:$0xff]  ;;  %v333_v6 = vld [vmem:[#allocation5 + $0x838] sm:$0xff] }
  0x90   :  { %1333 = vmatpush1.bf16.msra.mxu0 %v1332_v13  ;;  %v1354_v13 = vpack.c.bf16 %v291_v8, %v287_v7  ;;  %v363_v56 = vld [vmem:[#allocation5 + $0x928] sm:$0xff] }
  0x91   :  { %1589 = vmatpush1.bf16.msra.mxu1 %v1588_v16  ;;  %1335 = vmatprep.subr.bf16.mxu0 %v1334_v17  ;;  %v288_v16 = vld [vmem:[#allocation5 + $0x6d0] sm:$0xff]  ;;  %v1610_v17 = vpack.c.bf16 %v293_v10, %v289_v9  ;;  %v1374_v9 = vpack.c.bf16 %v331_v4, %v327_v3  ;;  %v326_v10 = vld [vmem:[#allocation5 + $0x800] sm:$0xff]  ;;  %v367_v3 = vld [vmem:[#allocation5 + $0x948] sm:$0xff] }
  0x92   :  { %1591 = vmatprep.subr.bf16.mxu1 %v1590_v21  ;;  %v297_v21 = vld [vmem:[#allocation5 + $0x718] sm:$0xff]  ;;  %v1612_v24 = vpack.c.bf16 %v292_v18, %v288_v16  ;;  %v339_v16 = vld [vmem:[#allocation5 + $0x868] sm:$0xff] }
  0x93   :  { %v341_v18 = vld [vmem:[#allocation5 + $0x878] sm:$0xff]  ;;  %v371_v4 = vld [vmem:[#allocation5 + $0x968] sm:$0xff] }
  0x94   :  { %1337 = vmatpush1.bf16.msra.mxu0 %v1336_v27  ;;  %v298_v27 = vld [vmem:[#allocation5 + $0x720] sm:$0xff] }
  0x95   :  { %1593 = vmatpush1.bf16.msra.mxu1 %v1592_v28  ;;  %1339 = vmatprep.subr.bf16.mxu0 %v1338_v29  ;;  %v296_v28 = vld [vmem:[#allocation5 + $0x710] sm:$0xff]  ;;  %v1614_v29 = vpack.c.bf16 %v301_v22, %v297_v21  ;;  %v1360_v35 = vpack.c.bf16 %v298_v27, %v294_v26  ;;  %v1378_v22 = vpack.c.bf16 %v339_v16, %v335_v15  ;;  %v375_v15 = vld [vmem:[#allocation5 + $0x988] sm:$0xff] }
  0x96   :  { %1595 = vmatprep.subr.bf16.mxu1 %v1594_v33  ;;  %v305_v33 = vld [vmem:[#allocation5 + $0x758] sm:$0xff]  ;;  %v1616_v36 = vpack.c.bf16 %v300_v30, %v296_v28  ;;  %v340_v27 = vld [vmem:[#allocation5 + $0x870] sm:$0xff]  ;;  %v343_v28 = vld [vmem:[#allocation5 + $0x888] sm:$0xff] }
  0x97   :  { %v345_v30 = vld [vmem:[#allocation5 + $0x898] sm:$0xff]  ;;  %v379_v16 = vld [vmem:[#allocation5 + $0x9a8] sm:$0xff] }
  0x98   :  { %1341 = vmatpush1.bf16.msra.mxu0 %v1340_v39  ;;  %v306_v39 = vld [vmem:[#allocation5 + $0x760] sm:$0xff] }
  0x99   :  { %1597 = vmatpush1.bf16.msra.mxu1 %v1596_v40  ;;  %1343 = vmatprep.subr.bf16.mxu0 %v1342_v41  ;;  %v304_v40 = vld [vmem:[#allocation5 + $0x750] sm:$0xff]  ;;  %v1618_v41 = vpack.c.bf16 %v309_v34, %v305_v33  ;;  %v1364_v47 = vpack.c.bf16 %v306_v39, %v302_v38  ;;  %v346_v38 = vld [vmem:[#allocation5 + $0x8a0] sm:$0xff] }
  0x9a   :  { %1599 = vmatprep.subr.bf16.mxu1 %v1598_v45  ;;  %v313_v45 = vld [vmem:[#allocation5 + $0x798] sm:$0xff]  ;;  %v1620_v48 = vpack.c.bf16 %v308_v42, %v304_v40  ;;  %v64_v34 = vld [vmem:[#allocation2 + $0x50] sm:$0xff]  ;;  %v1638_v40 = vpack.c.bf16 %v349_v31, %v345_v30  ;;  %v351_v42 = vld [vmem:[#allocation5 + $0x8c8] sm:$0xff] }
  0x9b   :  { %v344_v39 = vld [vmem:[#allocation5 + $0x890] sm:$0xff]  ;;  %v389_v30 = vld [vmem:[#allocation5 + $0x9f8] sm:$0xff] }
  0x9c   :  { %1345 = vmatpush1.bf16.msra.mxu0 %v1344_v51  ;;  %v314_v51 = vld [vmem:[#allocation5 + $0x7a0] sm:$0xff] }
  0x9d   :  { %1601 = vmatpush1.bf16.msra.mxu1 %v1600_v52  ;;  %1347 = vmatprep.subr.bf16.mxu0 %v1346_v53  ;;  %v312_v52 = vld [vmem:[#allocation5 + $0x790] sm:$0xff]  ;;  %v1622_v53 = vpack.c.bf16 %v317_v46, %v313_v45  ;;  %v1368_v59 = vpack.c.bf16 %v314_v51, %v310_v50  ;;  %v357_v45 = vld [vmem:[#allocation5 + $0x8f8] sm:$0xff]  ;;  %v59_v46 = vld [vmem:[#allocation2 + $0x28] sm:$0xff] }
  0x9e   :  { %1603 = vmatprep.subr.bf16.mxu1 %v1602_v57  ;;  %v321_v57 = vld [vmem:[#allocation5 + $0x7d8] sm:$0xff]  ;;  %v1624_v60 = vpack.c.bf16 %v316_v54, %v312_v52  ;;  %v350_v50 = vld [vmem:[#allocation5 + $0x8c0] sm:$0xff]  ;;  %v352_v52 = vld [vmem:[#allocation5 + $0x8d0] sm:$0xff] }
  0x9f   :  { %v354_v51 = vld [vmem:[#allocation5 + $0x8e0] sm:$0xff]  ;;  %v356_v54 = vld [vmem:[#allocation5 + $0x8f0] sm:$0xff] }
  0xa0   :  { %1349 = vmatpush1.bf16.msra.mxu0 %v1348_v63  ;;  %v322_v63 = vld [vmem:[#allocation5 + $0x7e0] sm:$0xff] }
  0xa1   :  { %1605 = vmatpush1.bf16.msra.mxu1 %v1604_v0  ;;  %1351 = vmatprep.subr.bf16.mxu0 %v1350_v1  ;;  %v320_v0 = vld [vmem:[#allocation5 + $0x7d0] sm:$0xff]  ;;  %v1626_v1 = vpack.c.bf16 %v325_v58, %v321_v57  ;;  %v1372_v7 = vpack.c.bf16 %v322_v63, %v318_v62  ;;  %v361_v57 = vld [vmem:[#allocation5 + $0x918] sm:$0xff]  ;;  %v358_v62 = vld [vmem:[#allocation5 + $0x900] sm:$0xff] }
  0xa2   :  { %1607 = vmatprep.subr.bf16.mxu1 %v1606_v5  ;;  %v329_v5 = vld [vmem:[#allocation5 + $0x818] sm:$0xff]  ;;  %v1628_v8 = vpack.c.bf16 %v324_v2, %v320_v0  ;;  %v362_v63 = vld [vmem:[#allocation5 + $0x920] sm:$0xff]  ;;  %v360_v0 = vld [vmem:[#allocation5 + $0x910] sm:$0xff] }
  0xa3   :  { %v365_v58 = vld [vmem:[#allocation5 + $0x938] sm:$0xff]  ;;  %v364_v2 = vld [vmem:[#allocation5 + $0x930] sm:$0xff] }
  0xa4   :  { %1353 = vmatpush1.bf16.msra.mxu0 %v1352_v11  ;;  %v330_v11 = vld [vmem:[#allocation5 + $0x820] sm:$0xff] }
  0xa5   :  { %1609 = vmatpush1.bf16.msra.mxu1 %v1608_v12  ;;  %1355 = vmatprep.subr.bf16.mxu0 %v1354_v13  ;;  %v328_v12 = vld [vmem:[#allocation5 + $0x810] sm:$0xff]  ;;  %v1630_v13 = vpack.c.bf16 %v333_v6, %v329_v5  ;;  %v1376_v20 = vpack.c.bf16 %v330_v11, %v326_v10  ;;  %v369_v5 = vld [vmem:[#allocation5 + $0x958] sm:$0xff]  ;;  %v366_v10 = vld [vmem:[#allocation5 + $0x940] sm:$0xff] }
  0xa6   :  { %1611 = vmatprep.subr.bf16.mxu1 %v1610_v17  ;;  %v337_v17 = vld [vmem:[#allocation5 + $0x858] sm:$0xff]  ;;  %v1632_v21 = vpack.c.bf16 %v332_v14, %v328_v12  ;;  %v370_v11 = vld [vmem:[#allocation5 + $0x960] sm:$0xff]  ;;  %v368_v12 = vld [vmem:[#allocation5 + $0x950] sm:$0xff] }
  0xa7   :  { %v1634_v26 = vpack.c.bf16 %v341_v18, %v337_v17  ;;  %v373_v6 = vld [vmem:[#allocation5 + $0x978] sm:$0xff]  ;;  %v372_v14 = vld [vmem:[#allocation5 + $0x970] sm:$0xff] }
  0xa8   :  { %1357 = vmatpush1.bf16.msra.mxu0 %v1356_v23  ;;  %v334_v23 = vld [vmem:[#allocation5 + $0x840] sm:$0xff]  ;;  %v377_v17 = vld [vmem:[#allocation5 + $0x998] sm:$0xff] }
  0xa9   :  { %1613 = vmatpush1.bf16.msra.mxu1 %v1612_v24  ;;  %1359 = vmatprep.subr.bf16.mxu0 %v1358_v25  ;;  %v338_v24 = vld [vmem:[#allocation5 + $0x860] sm:$0xff]  ;;  %v336_v25 = vld [vmem:[#allocation5 + $0x850] sm:$0xff]  ;;  %v381_v18 = vld [vmem:[#allocation5 + $0x9b8] sm:$0xff] }
  0xaa   :  { %1615 = vmatprep.subr.bf16.mxu1 %v1614_v29  ;;  %v347_v29 = vld [vmem:[#allocation5 + $0x8a8] sm:$0xff]  ;;  %v1380_v33 = vpack.c.bf16 %v338_v24, %v334_v23  ;;  %v378_v23 = vld [vmem:[#allocation5 + $0x9a0] sm:$0xff]  ;;  %v376_v24 = vld [vmem:[#allocation5 + $0x990] sm:$0xff] }
  0xac   :  { %1361 = vmatpush1.bf16.msra.mxu0 %v1360_v35  ;;  %v1636_v35 = vpack.c.bf16 %v340_v27, %v336_v25  ;;  %v1654_v25 = vpack.c.bf16 %v381_v18, %v377_v17  ;;  %v383_v27 = vld [vmem:[#allocation5 + $0x9c8] sm:$0xff]  ;;  %v414_v18 = vld [vmem:[#allocation5 + $0xac0] sm:$0xff] }
  0xad   :  { %1617 = vmatpush1.bf16.msra.mxu1 %v1616_v36  ;;  %1363 = vmatprep.subr.bf16.mxu0 %v1362_v37  ;;  %v1382_v36 = vpack.c.bf16 %v347_v29, %v343_v28  ;;  %v342_v37 = vld [vmem:[#allocation5 + $0x880] sm:$0xff]  ;;  %v387_v28 = vld [vmem:[#allocation5 + $0x9e8] sm:$0xff]  ;;  %v385_v29 = vld [vmem:[#allocation5 + $0x9d8] sm:$0xff] }
  0xae   :  { %1619 = vmatprep.subr.bf16.mxu1 %v1618_v41  ;;  %v348_v41 = vld [vmem:[#allocation5 + $0x8b0] sm:$0xff] }
  0xb0   :  { %1365 = vmatpush1.bf16.msra.mxu0 %v1364_v47  ;;  %v1384_v47 = vpack.c.bf16 %v346_v38, %v342_v37  ;;  %v1658_v37 = vpack.c.bf16 %v389_v30, %v385_v29  ;;  %v388_v38 = vld [vmem:[#allocation5 + $0x9f0] sm:$0xff]  ;;  %v422_v30 = vld [vmem:[#allocation5 + $0xb00] sm:$0xff] }
  0xb1   :  { %1621 = vmatpush1.bf16.msra.mxu1 %v1620_v48  ;;  %1367 = vmatprep.subr.bf16.mxu0 %v1366_v49  ;;  %v1640_v48 = vpack.c.bf16 %v348_v41, %v344_v39  ;;  %v1386_v49 = vpack.c.bf16 %v355_v43, %v351_v42  ;;  %v391_v39 = vld [vmem:[#allocation5 + $0xa08] sm:$0xff]  ;;  %v393_v41 = vld [vmem:[#allocation5 + $0xa18] sm:$0xff] }
  0xb2   :  { %1623 = vmatprep.subr.bf16.mxu1 %v1622_v53  ;;  %v1642_v53 = vpack.c.bf16 %v357_v45, %v353_v44  ;;  %v397_v42 = vld [vmem:[#allocation5 + $0xa38] sm:$0xff] }
  0xb4   :  { %1369 = vmatpush1.bf16.msra.mxu0 %v1368_v59  ;;  %v1388_v59 = vpack.c.bf16 %v354_v51, %v350_v50  ;;  %v396_v50 = vld [vmem:[#allocation5 + $0xa30] sm:$0xff]  ;;  %v399_v51 = vld [vmem:[#allocation5 + $0xa48] sm:$0xff] }
  0xb5   :  { %1625 = vmatpush1.bf16.msra.mxu1 %v1624_v60  ;;  %1371 = vmatprep.subr.bf16.mxu0 %v1370_v61  ;;  %v1644_v60 = vpack.c.bf16 %v356_v54, %v352_v52  ;;  %v1390_v61 = vpack.c.bf16 %v363_v56, %v359_v55  ;;  %v403_v52 = vld [vmem:[#allocation5 + $0xa68] sm:$0xff]  ;;  %v405_v54 = vld [vmem:[#allocation5 + $0xa78] sm:$0xff] }
  0xb6   :  { %1627 = vmatprep.subr.bf16.mxu1 %v1626_v1  ;;  %v1646_v1 = vpack.c.bf16 %v365_v58, %v361_v57  ;;  %v1410_v57 = vpack.c.bf16 %v403_v52, %v399_v51  ;;  %v398_v58 = vld [vmem:[#allocation5 + $0xa40] sm:$0xff] }
  0xb8   :  { %1373 = vmatpush1.bf16.msra.mxu0 %v1372_v7  ;;  %v1392_v7 = vpack.c.bf16 %v362_v63, %v358_v62  ;;  %v404_v62 = vld [vmem:[#allocation5 + $0xa70] sm:$0xff]  ;;  %v407_v63 = vld [vmem:[#allocation5 + $0xa88] sm:$0xff] }
  0xb9   :  { %1629 = vmatpush1.bf16.msra.mxu1 %v1628_v8  ;;  %1375 = vmatprep.subr.bf16.mxu0 %v1374_v9  ;;  %v1648_v8 = vpack.c.bf16 %v364_v2, %v360_v0  ;;  %v1394_v9 = vpack.c.bf16 %v371_v4, %v367_v3  ;;  %v411_v0 = vld [vmem:[#allocation5 + $0xaa8] sm:$0xff]  ;;  %v413_v2 = vld [vmem:[#allocation5 + $0xab8] sm:$0xff] }
  0xba   :  { %1631 = vmatprep.subr.bf16.mxu1 %v1630_v13  ;;  %v1650_v13 = vpack.c.bf16 %v373_v6, %v369_v5  ;;  %v1414_v5 = vpack.c.bf16 %v411_v0, %v407_v63  ;;  %v406_v6 = vld [vmem:[#allocation5 + $0xa80] sm:$0xff] }
  0xbb   :  { %746 = vmatmul.mubr.f32.vlgmr.msra.gmra.mrb[0].mxu0 %v56_v19 }
  0xbc   :  { %1377 = vmatpush1.bf16.msra.mxu0 %v1376_v20  ;;  %1054 = vmatmul.mubr.f32.vlgmr.msra.gmra.mrb[0].mxu1 %v56_v19  ;;  %v1396_v19 = vpack.c.bf16 %v370_v11, %v366_v10  ;;  %v1652_v20 = vpack.c.bf16 %v372_v14, %v368_v12  ;;  %v412_v10 = vld [vmem:[#allocation5 + $0xab0] sm:$0xff]  ;;  %v415_v11 = vld [vmem:[#allocation5 + $0xac8] sm:$0xff]  ;;  %v421_v14 = vld [vmem:[#allocation5 + $0xaf8] sm:$0xff] }
  0xbd   :  { %1633 = vmatpush1.bf16.msra.mxu1 %v1632_v21  ;;  %1379 = vmatprep.subr.bf16.mxu0 %v1378_v22  ;;  %v1398_v21 = vpack.c.bf16 %v379_v16, %v375_v15  ;;  %v374_v22 = vld [vmem:[#allocation5 + $0x980] sm:$0xff]  ;;  %v419_v12 = vld [vmem:[#allocation5 + $0xae8] sm:$0xff] }
  0xbe   :  { %1635 = vmatprep.subr.bf16.mxu1 %v1634_v26  ;;  %751 = vmatprep.mubr.f32.mxu0 %v65_v32  ;;  %v380_v26 = vld [vmem:[#allocation5 + $0x9b0] sm:$0xff]  ;;  %v1400_v31 = vpack.c.bf16 %v378_v23, %v374_v22  ;;  %v1418_v17 = vpack.c.bf16 %v419_v12, %v415_v11  ;;  %v423_v23 = vld [vmem:[#allocation5 + $0xb08] sm:$0xff] }
  0xbf   :  { %1059 = vmatprep.mubr.f32.mxu1 %v65_v32  ;;  %752 = vmatmul.mubr.f32.gmra.mrb[2].mxu0 %v64_v34  ;;  %v1656_v32 = vpack.c.bf16 %v380_v26, %v376_v24  ;;  %v420_v22 = vld [vmem:[#allocation5 + $0xaf0] sm:$0xff]  ;;  %v427_v24 = vld [vmem:[#allocation5 + $0xb28] sm:$0xff]  ;;  %v429_v26 = vld [vmem:[#allocation5 + $0xb38] sm:$0xff] }
  0xc0   :  { %1381 = vmatpush1.bf16.msra.mxu0 %v1380_v33  ;;  %1060 = vmatmul.mubr.f32.gmra.mrb[2].mxu1 %v64_v34  ;;  %v1402_v33 = vpack.c.bf16 %v387_v28, %v383_v27  ;;  %v382_v34 = vld [vmem:[#allocation5 + $0x9c0] sm:$0xff]  ;;  %v1422_v29 = vpack.c.bf16 %v427_v24, %v423_v23 }
  0xc1   :  { %1637 = vmatpush1.bf16.msra.mxu1 %v1636_v35  ;;  %1383 = vmatprep.subr.bf16.mxu0 %v1382_v36  ;;  %v386_v35 = vld [vmem:[#allocation5 + $0x9e0] sm:$0xff]  ;;  %v384_v36 = vld [vmem:[#allocation5 + $0x9d0] sm:$0xff] }
  0xc2   :  { %1639 = vmatprep.subr.bf16.mxu1 %v1638_v40  ;;  %822 = vmatprep.mubr.f32.mxu0 %v59_v46  ;;  %v395_v40 = vld [vmem:[#allocation5 + $0xa28] sm:$0xff]  ;;  %v1404_v43 = vpack.c.bf16 %v386_v35, %v382_v34  ;;  %v1660_v44 = vpack.c.bf16 %v388_v38, %v384_v36  ;;  %v428_v34 = vld [vmem:[#allocation5 + $0xb30] sm:$0xff]  ;;  %v437_v38 = vld [vmem:[#allocation5 + $0xb78] sm:$0xff] }
  0xc3   :  { %1130 = vmatprep.mubr.f32.mxu1 %v59_v46  ;;  %v1406_v45 = vpack.c.bf16 %v395_v40, %v391_v39  ;;  %v390_v46 = vld [vmem:[#allocation5 + $0xa00] sm:$0xff]  ;;  %v431_v35 = vld [vmem:[#allocation5 + $0xb48] sm:$0xff] }
  0xc4   :  { %1385 = vmatpush1.bf16.msra.mxu0 %v1384_v47  ;;  %v394_v47 = vld [vmem:[#allocation5 + $0xa20] sm:$0xff]  ;;  %v435_v36 = vld [vmem:[#allocation5 + $0xb68] sm:$0xff] }
  0xc5   :  { %1641 = vmatpush1.bf16.msra.mxu1 %v1640_v48  ;;  %1387 = vmatprep.subr.bf16.mxu0 %v1386_v49  ;;  %v392_v48 = vld [vmem:[#allocation5 + $0xa10] sm:$0xff]  ;;  %v1662_v49 = vpack.c.bf16 %v397_v42, %v393_v41  ;;  %v1408_v55 = vpack.c.bf16 %v394_v47, %v390_v46  ;;  %v1426_v41 = vpack.c.bf16 %v435_v36, %v431_v35  ;;  %v430_v42 = vld [vmem:[#allocation5 + $0xb40] sm:$0xff]  ;;  %v439_v47 = vld [vmem:[#allocation5 + $0xb88] sm:$0xff] }
  0xc6   :  { %1643 = vmatprep.subr.bf16.mxu1 %v1642_v53  ;;  %v401_v53 = vld [vmem:[#allocation5 + $0xa58] sm:$0xff]  ;;  %v1664_v56 = vpack.c.bf16 %v396_v50, %v392_v48  ;;  %v436_v46 = vld [vmem:[#allocation5 + $0xb70] sm:$0xff]  ;;  %v443_v48 = vld [vmem:[#allocation5 + $0xba8] sm:$0xff] }
  0xc7   :  { %v445_v50 = vld [vmem:[#allocation5 + $0xbb8] sm:$0xff]  ;;  %v58_v23 = vld [vmem:[#allocation2 + $0x20] sm:$0xff]  ;;  %v67_v36 = vld [vmem:[#allocation2 + $0x68] sm:$0xff] }
  0xc8   :  { %1389 = vmatpush1.bf16.msra.mxu0 %v1388_v59  ;;  %v402_v59 = vld [vmem:[#allocation5 + $0xa60] sm:$0xff]  ;;  %v477_v35 = vld [vmem:[#allocation5 + $0xcb8] sm:$0xff] }
  0xc9   :  { %1645 = vmatpush1.bf16.msra.mxu1 %v1644_v60  ;;  %1391 = vmatprep.subr.bf16.mxu0 %v1390_v61  ;;  %v400_v60 = vld [vmem:[#allocation5 + $0xa50] sm:$0xff]  ;;  %v1666_v61 = vpack.c.bf16 %v405_v54, %v401_v53  ;;  %v1412_v3 = vpack.c.bf16 %v402_v59, %v398_v58  ;;  %v1430_v53 = vpack.c.bf16 %v443_v48, %v439_v47  ;;  %v438_v54 = vld [vmem:[#allocation5 + $0xb80] sm:$0xff]  ;;  %v447_v59 = vld [vmem:[#allocation5 + $0xbc8] sm:$0xff] }
  0xca   :  { %1647 = vmatprep.subr.bf16.mxu1 %v1646_v1  ;;  %v409_v1 = vld [vmem:[#allocation5 + $0xa98] sm:$0xff]  ;;  %v1668_v4 = vpack.c.bf16 %v404_v62, %v400_v60  ;;  %v444_v58 = vld [vmem:[#allocation5 + $0xbb0] sm:$0xff]  ;;  %v451_v60 = vld [vmem:[#allocation5 + $0xbe8] sm:$0xff] }
  0xcb   :  { %v453_v62 = vld [vmem:[#allocation5 + $0xbf8] sm:$0xff]  ;;  %v483_v47 = vld [vmem:[#allocation5 + $0xce8] sm:$0xff] }
  0xcc   :  { %1393 = vmatpush1.bf16.msra.mxu0 %v1392_v7  ;;  %v410_v7 = vld [vmem:[#allocation5 + $0xaa0] sm:$0xff]  ;;  %v481_v48 = vld [vmem:[#allocation5 + $0xcd8] sm:$0xff] }
  0xcd   :  { %1649 = vmatpush1.bf16.msra.mxu1 %v1648_v8  ;;  %1395 = vmatprep.subr.bf16.mxu0 %v1394_v9  ;;  %v408_v8 = vld [vmem:[#allocation5 + $0xa90] sm:$0xff]  ;;  %v1670_v9 = vpack.c.bf16 %v413_v2, %v409_v1  ;;  %v1416_v15 = vpack.c.bf16 %v410_v7, %v406_v6  ;;  %v1434_v1 = vpack.c.bf16 %v451_v60, %v447_v59  ;;  %v446_v2 = vld [vmem:[#allocation5 + $0xbc0] sm:$0xff]  ;;  %v455_v7 = vld [vmem:[#allocation5 + $0xc08] sm:$0xff] }
  0xce   :  { %1651 = vmatprep.subr.bf16.mxu1 %v1650_v13  ;;  %v417_v13 = vld [vmem:[#allocation5 + $0xad8] sm:$0xff]  ;;  %v1672_v16 = vpack.c.bf16 %v412_v10, %v408_v8  ;;  %v452_v6 = vld [vmem:[#allocation5 + $0xbf0] sm:$0xff]  ;;  %v459_v8 = vld [vmem:[#allocation5 + $0xc28] sm:$0xff] }
  0xcf   :  { %v461_v10 = vld [vmem:[#allocation5 + $0xc38] sm:$0xff]  ;;  %v487_v59 = vld [vmem:[#allocation5 + $0xd08] sm:$0xff] }
  0xd0   :  { %1397 = vmatpush1.bf16.msra.mxu0 %v1396_v19  ;;  %v418_v19 = vld [vmem:[#allocation5 + $0xae0] sm:$0xff]  ;;  %v491_v60 = vld [vmem:[#allocation5 + $0xd28] sm:$0xff] }
  0xd1   :  { %1653 = vmatpush1.bf16.msra.mxu1 %v1652_v20  ;;  %1399 = vmatprep.subr.bf16.mxu0 %v1398_v21  ;;  %v416_v20 = vld [vmem:[#allocation5 + $0xad0] sm:$0xff]  ;;  %v1674_v21 = vpack.c.bf16 %v421_v14, %v417_v13  ;;  %v1420_v27 = vpack.c.bf16 %v418_v19, %v414_v18  ;;  %v1438_v13 = vpack.c.bf16 %v459_v8, %v455_v7  ;;  %v454_v14 = vld [vmem:[#allocation5 + $0xc00] sm:$0xff]  ;;  %v463_v19 = vld [vmem:[#allocation5 + $0xc48] sm:$0xff] }
  0xd2   :  { %1655 = vmatprep.subr.bf16.mxu1 %v1654_v25  ;;  %v425_v25 = vld [vmem:[#allocation5 + $0xb18] sm:$0xff]  ;;  %v1676_v28 = vpack.c.bf16 %v420_v22, %v416_v20  ;;  %v460_v18 = vld [vmem:[#allocation5 + $0xc30] sm:$0xff]  ;;  %v467_v20 = vld [vmem:[#allocation5 + $0xc68] sm:$0xff] }
  0xd3   :  { %v469_v22 = vld [vmem:[#allocation5 + $0xc78] sm:$0xff]  ;;  %v495_v7 = vld [vmem:[#allocation5 + $0xd48] sm:$0xff] }
  0xd4   :  { %1401 = vmatpush1.bf16.msra.mxu0 %v1400_v31  ;;  %v426_v31 = vld [vmem:[#allocation5 + $0xb20] sm:$0xff]  ;;  %v499_v8 = vld [vmem:[#allocation5 + $0xd68] sm:$0xff] }
  0xd5   :  { %1657 = vmatpush1.bf16.msra.mxu1 %v1656_v32  ;;  %1403 = vmatprep.subr.bf16.mxu0 %v1402_v33  ;;  %v424_v32 = vld [vmem:[#allocation5 + $0xb10] sm:$0xff]  ;;  %v1678_v33 = vpack.c.bf16 %v429_v26, %v425_v25  ;;  %v1424_v39 = vpack.c.bf16 %v426_v31, %v422_v30  ;;  %v1442_v26 = vpack.c.bf16 %v467_v20, %v463_v19  ;;  %v503_v19 = vld [vmem:[#allocation5 + $0xd88] sm:$0xff] }
  0xd6   :  { %1659 = vmatprep.subr.bf16.mxu1 %v1658_v37  ;;  %v433_v37 = vld [vmem:[#allocation5 + $0xb58] sm:$0xff]  ;;  %v1680_v40 = vpack.c.bf16 %v428_v34, %v424_v32  ;;  %v468_v31 = vld [vmem:[#allocation5 + $0xc70] sm:$0xff]  ;;  %v471_v32 = vld [vmem:[#allocation5 + $0xc88] sm:$0xff] }
  0xd7   :  { %v473_v34 = vld [vmem:[#allocation5 + $0xc98] sm:$0xff]  ;;  %v507_v20 = vld [vmem:[#allocation5 + $0xda8] sm:$0xff] }
  0xd8   :  { %1405 = vmatpush1.bf16.msra.mxu0 %v1404_v43  ;;  %v434_v43 = vld [vmem:[#allocation5 + $0xb60] sm:$0xff] }
  0xd9   :  { %1661 = vmatpush1.bf16.msra.mxu1 %v1660_v44  ;;  %1407 = vmatprep.subr.bf16.mxu0 %v1406_v45  ;;  %v432_v44 = vld [vmem:[#allocation5 + $0xb50] sm:$0xff]  ;;  %v1682_v45 = vpack.c.bf16 %v437_v38, %v433_v37  ;;  %v1428_v51 = vpack.c.bf16 %v434_v43, %v430_v42  ;;  %v66_v38 = vld [vmem:[#allocation2 + $0x60] sm:$0xff] }
  0xda   :  { %1663 = vmatprep.subr.bf16.mxu1 %v1662_v49  ;;  %v441_v49 = vld [vmem:[#allocation5 + $0xb98] sm:$0xff]  ;;  %v1684_v52 = vpack.c.bf16 %v436_v46, %v432_v44  ;;  %v474_v42 = vld [vmem:[#allocation5 + $0xca0] sm:$0xff]  ;;  %v472_v43 = vld [vmem:[#allocation5 + $0xc90] sm:$0xff]  ;;  %v1702_v44 = vpack.c.bf16 %v477_v35, %v473_v34 }
  0xdb   :  { %v479_v46 = vld [vmem:[#allocation5 + $0xcc8] sm:$0xff]  ;;  %v517_v34 = vld [vmem:[#allocation5 + $0xdf8] sm:$0xff] }
  0xdc   :  { %1409 = vmatpush1.bf16.msra.mxu0 %v1408_v55  ;;  %v442_v55 = vld [vmem:[#allocation5 + $0xba0] sm:$0xff] }
  0xdd   :  { %1665 = vmatpush1.bf16.msra.mxu1 %v1664_v56  ;;  %1411 = vmatprep.subr.bf16.mxu0 %v1410_v57  ;;  %v440_v56 = vld [vmem:[#allocation5 + $0xb90] sm:$0xff]  ;;  %v1686_v57 = vpack.c.bf16 %v445_v50, %v441_v49  ;;  %v1432_v63 = vpack.c.bf16 %v442_v55, %v438_v54  ;;  %v485_v49 = vld [vmem:[#allocation5 + $0xcf8] sm:$0xff]  ;;  %v478_v54 = vld [vmem:[#allocation5 + $0xcc0] sm:$0xff] }
  0xde   :  { %1667 = vmatprep.subr.bf16.mxu1 %v1666_v61  ;;  %v449_v61 = vld [vmem:[#allocation5 + $0xbd8] sm:$0xff]  ;;  %v1688_v0 = vpack.c.bf16 %v444_v58, %v440_v56  ;;  %v482_v55 = vld [vmem:[#allocation5 + $0xce0] sm:$0xff]  ;;  %v480_v56 = vld [vmem:[#allocation5 + $0xcd0] sm:$0xff] }
  0xdf   :  { %v61_v50 = vld [vmem:[#allocation2 + $0x38] sm:$0xff]  ;;  %v484_v58 = vld [vmem:[#allocation5 + $0xcf0] sm:$0xff] }
  0xe0   :  { %1413 = vmatpush1.bf16.msra.mxu0 %v1412_v3  ;;  %v450_v3 = vld [vmem:[#allocation5 + $0xbe0] sm:$0xff] }
  0xe1   :  { %1669 = vmatpush1.bf16.msra.mxu1 %v1668_v4  ;;  %1415 = vmatprep.subr.bf16.mxu0 %v1414_v5  ;;  %v448_v4 = vld [vmem:[#allocation5 + $0xbd0] sm:$0xff]  ;;  %v1690_v5 = vpack.c.bf16 %v453_v62, %v449_v61  ;;  %v1436_v11 = vpack.c.bf16 %v450_v3, %v446_v2  ;;  %v489_v61 = vld [vmem:[#allocation5 + $0xd18] sm:$0xff]  ;;  %v486_v2 = vld [vmem:[#allocation5 + $0xd00] sm:$0xff] }
  0xe2   :  { %1671 = vmatprep.subr.bf16.mxu1 %v1670_v9  ;;  %v457_v9 = vld [vmem:[#allocation5 + $0xc18] sm:$0xff]  ;;  %v1692_v12 = vpack.c.bf16 %v452_v6, %v448_v4  ;;  %v490_v3 = vld [vmem:[#allocation5 + $0xd20] sm:$0xff]  ;;  %v488_v4 = vld [vmem:[#allocation5 + $0xd10] sm:$0xff] }
  0xe3   :  { %v493_v62 = vld [vmem:[#allocation5 + $0xd38] sm:$0xff]  ;;  %v492_v6 = vld [vmem:[#allocation5 + $0xd30] sm:$0xff] }
  0xe4   :  { %1417 = vmatpush1.bf16.msra.mxu0 %v1416_v15  ;;  %v458_v15 = vld [vmem:[#allocation5 + $0xc20] sm:$0xff] }
  0xe5   :  { %1673 = vmatpush1.bf16.msra.mxu1 %v1672_v16  ;;  %1419 = vmatprep.subr.bf16.mxu0 %v1418_v17  ;;  %v456_v16 = vld [vmem:[#allocation5 + $0xc10] sm:$0xff]  ;;  %v1694_v17 = vpack.c.bf16 %v461_v10, %v457_v9  ;;  %v1440_v24 = vpack.c.bf16 %v458_v15, %v454_v14  ;;  %v497_v9 = vld [vmem:[#allocation5 + $0xd58] sm:$0xff]  ;;  %v494_v14 = vld [vmem:[#allocation5 + $0xd40] sm:$0xff] }
  0xe6   :  { %1675 = vmatprep.subr.bf16.mxu1 %v1674_v21  ;;  %v465_v21 = vld [vmem:[#allocation5 + $0xc58] sm:$0xff]  ;;  %v1696_v25 = vpack.c.bf16 %v460_v18, %v456_v16  ;;  %v498_v15 = vld [vmem:[#allocation5 + $0xd60] sm:$0xff]  ;;  %v496_v16 = vld [vmem:[#allocation5 + $0xd50] sm:$0xff] }
  0xe7   :  { %v1698_v30 = vpack.c.bf16 %v469_v22, %v465_v21  ;;  %v501_v10 = vld [vmem:[#allocation5 + $0xd78] sm:$0xff]  ;;  %v500_v18 = vld [vmem:[#allocation5 + $0xd70] sm:$0xff] }
  0xe8   :  { %1421 = vmatpush1.bf16.msra.mxu0 %v1420_v27  ;;  %v462_v27 = vld [vmem:[#allocation5 + $0xc40] sm:$0xff]  ;;  %v505_v21 = vld [vmem:[#allocation5 + $0xd98] sm:$0xff] }
  0xe9   :  { %1677 = vmatpush1.bf16.msra.mxu1 %v1676_v28  ;;  %1423 = vmatprep.subr.bf16.mxu0 %v1422_v29  ;;  %v466_v28 = vld [vmem:[#allocation5 + $0xc60] sm:$0xff]  ;;  %v464_v29 = vld [vmem:[#allocation5 + $0xc50] sm:$0xff]  ;;  %v509_v22 = vld [vmem:[#allocation5 + $0xdb8] sm:$0xff] }
  0xea   :  { %1679 = vmatprep.subr.bf16.mxu1 %v1678_v33  ;;  %v475_v33 = vld [vmem:[#allocation5 + $0xca8] sm:$0xff]  ;;  %v1444_v37 = vpack.c.bf16 %v466_v28, %v462_v27  ;;  %v506_v27 = vld [vmem:[#allocation5 + $0xda0] sm:$0xff]  ;;  %v504_v28 = vld [vmem:[#allocation5 + $0xd90] sm:$0xff] }
  0xec   :  { %1425 = vmatpush1.bf16.msra.mxu0 %v1424_v39  ;;  %v1700_v39 = vpack.c.bf16 %v468_v31, %v464_v29  ;;  %v1718_v29 = vpack.c.bf16 %v509_v22, %v505_v21  ;;  %v511_v31 = vld [vmem:[#allocation5 + $0xdc8] sm:$0xff]  ;;  %v542_v22 = vld [vmem:[#allocation5 + $0xec0] sm:$0xff] }
  0xed   :  { %1681 = vmatpush1.bf16.msra.mxu1 %v1680_v40  ;;  %1427 = vmatprep.subr.bf16.mxu0 %v1426_v41  ;;  %v1446_v40 = vpack.c.bf16 %v475_v33, %v471_v32  ;;  %v470_v41 = vld [vmem:[#allocation5 + $0xc80] sm:$0xff]  ;;  %v515_v32 = vld [vmem:[#allocation5 + $0xde8] sm:$0xff]  ;;  %v513_v33 = vld [vmem:[#allocation5 + $0xdd8] sm:$0xff] }
  0xee   :  { %1683 = vmatprep.subr.bf16.mxu1 %v1682_v45  ;;  %v476_v45 = vld [vmem:[#allocation5 + $0xcb0] sm:$0xff] }
  0xf0   :  { %1429 = vmatpush1.bf16.msra.mxu0 %v1428_v51  ;;  %v1448_v51 = vpack.c.bf16 %v474_v42, %v470_v41  ;;  %v1722_v41 = vpack.c.bf16 %v517_v34, %v513_v33  ;;  %v516_v42 = vld [vmem:[#allocation5 + $0xdf0] sm:$0xff]  ;;  %v550_v34 = vld [vmem:[#allocation5 + $0xf00] sm:$0xff] }
  0xf1   :  { %1685 = vmatpush1.bf16.msra.mxu1 %v1684_v52  ;;  %1431 = vmatprep.subr.bf16.mxu0 %v1430_v53  ;;  %v1704_v52 = vpack.c.bf16 %v476_v45, %v472_v43  ;;  %v1450_v53 = vpack.c.bf16 %v483_v47, %v479_v46  ;;  %v519_v43 = vld [vmem:[#allocation5 + $0xe08] sm:$0xff]  ;;  %v521_v45 = vld [vmem:[#allocation5 + $0xe18] sm:$0xff] }
  0xf2   :  { %1687 = vmatprep.subr.bf16.mxu1 %v1686_v57  ;;  %v1706_v57 = vpack.c.bf16 %v485_v49, %v481_v48  ;;  %v525_v46 = vld [vmem:[#allocation5 + $0xe38] sm:$0xff] }
  0xf4   :  { %1433 = vmatpush1.bf16.msra.mxu0 %v1432_v63  ;;  %v1452_v63 = vpack.c.bf16 %v482_v55, %v478_v54  ;;  %v524_v54 = vld [vmem:[#allocation5 + $0xe30] sm:$0xff]  ;;  %v527_v55 = vld [vmem:[#allocation5 + $0xe48] sm:$0xff] }
  0xf5   :  { %1689 = vmatpush1.bf16.msra.mxu1 %v1688_v0  ;;  %1435 = vmatprep.subr.bf16.mxu0 %v1434_v1  ;;  %v1708_v0 = vpack.c.bf16 %v484_v58, %v480_v56  ;;  %v1454_v1 = vpack.c.bf16 %v491_v60, %v487_v59  ;;  %v531_v56 = vld [vmem:[#allocation5 + $0xe68] sm:$0xff]  ;;  %v533_v58 = vld [vmem:[#allocation5 + $0xe78] sm:$0xff] }
  0xf6   :  { %1691 = vmatprep.subr.bf16.mxu1 %v1690_v5  ;;  %v1710_v5 = vpack.c.bf16 %v493_v62, %v489_v61  ;;  %v1474_v61 = vpack.c.bf16 %v531_v56, %v527_v55  ;;  %v526_v62 = vld [vmem:[#allocation5 + $0xe40] sm:$0xff] }
  0xf8   :  { %1437 = vmatpush1.bf16.msra.mxu0 %v1436_v11  ;;  %v1456_v11 = vpack.c.bf16 %v490_v3, %v486_v2  ;;  %v532_v2 = vld [vmem:[#allocation5 + $0xe70] sm:$0xff]  ;;  %v535_v3 = vld [vmem:[#allocation5 + $0xe88] sm:$0xff] }
  0xf9   :  { %1693 = vmatpush1.bf16.msra.mxu1 %v1692_v12  ;;  %1439 = vmatprep.subr.bf16.mxu0 %v1438_v13  ;;  %v1712_v12 = vpack.c.bf16 %v492_v6, %v488_v4  ;;  %v1458_v13 = vpack.c.bf16 %v499_v8, %v495_v7  ;;  %v539_v4 = vld [vmem:[#allocation5 + $0xea8] sm:$0xff]  ;;  %v541_v6 = vld [vmem:[#allocation5 + $0xeb8] sm:$0xff] }
  0xfa   :  { %1695 = vmatprep.subr.bf16.mxu1 %v1694_v17  ;;  %v1714_v17 = vpack.c.bf16 %v501_v10, %v497_v9  ;;  %v1478_v9 = vpack.c.bf16 %v539_v4, %v535_v3  ;;  %v534_v10 = vld [vmem:[#allocation5 + $0xe80] sm:$0xff] }
  0xfb   :  { %823 = vmatmul.mubr.f32.vlgmr.msra.gmra.mrb[0].mxu0 %v58_v23 }
  0xfc   :  { %1441 = vmatpush1.bf16.msra.mxu0 %v1440_v24  ;;  %1131 = vmatmul.mubr.f32.vlgmr.msra.gmra.mrb[0].mxu1 %v58_v23  ;;  %v1460_v23 = vpack.c.bf16 %v498_v15, %v494_v14  ;;  %v1716_v24 = vpack.c.bf16 %v500_v18, %v496_v16  ;;  %v540_v14 = vld [vmem:[#allocation5 + $0xeb0] sm:$0xff]  ;;  %v543_v15 = vld [vmem:[#allocation5 + $0xec8] sm:$0xff]  ;;  %v549_v18 = vld [vmem:[#allocation5 + $0xef8] sm:$0xff] }
  0xfd   :  { %1697 = vmatpush1.bf16.msra.mxu1 %v1696_v25  ;;  %1443 = vmatprep.subr.bf16.mxu0 %v1442_v26  ;;  %v1462_v25 = vpack.c.bf16 %v507_v20, %v503_v19  ;;  %v502_v26 = vld [vmem:[#allocation5 + $0xd80] sm:$0xff]  ;;  %v547_v16 = vld [vmem:[#allocation5 + $0xee8] sm:$0xff] }
  0xfe   :  { %1699 = vmatprep.subr.bf16.mxu1 %v1698_v30  ;;  %828 = vmatprep.mubr.f32.mxu0 %v67_v36  ;;  %v508_v30 = vld [vmem:[#allocation5 + $0xdb0] sm:$0xff]  ;;  %v1464_v35 = vpack.c.bf16 %v506_v27, %v502_v26  ;;  %v1482_v21 = vpack.c.bf16 %v547_v16, %v543_v15  ;;  %v551_v27 = vld [vmem:[#allocation5 + $0xf08] sm:$0xff]  ;;  %v584_v16 = vlaneseq }
  0xff   :  { %1136 = vmatprep.mubr.f32.mxu1 %v67_v36  ;;  %829 = vmatmul.mubr.f32.gmra.mrb[2].mxu0 %v66_v38  ;;  %v1720_v36 = vpack.c.bf16 %v508_v30, %v504_v28  ;;  %v548_v26 = vld [vmem:[#allocation5 + $0xef0] sm:$0xff]  ;;  %v555_v28 = vld [vmem:[#allocation5 + $0xf28] sm:$0xff]  ;;  %v557_v30 = vld [vmem:[#allocation5 + $0xf38] sm:$0xff] }
 0x100   :  { %1445 = vmatpush1.bf16.msra.mxu0 %v1444_v37  ;;  %1137 = vmatmul.mubr.f32.gmra.mrb[2].mxu1 %v66_v38  ;;  %v1466_v37 = vpack.c.bf16 %v515_v32, %v511_v31  ;;  %v510_v38 = vld [vmem:[#allocation5 + $0xdc0] sm:$0xff]  ;;  %v1486_v33 = vpack.c.bf16 %v555_v28, %v551_v27  ;;  %v68_v15 = vld [vmem:[#allocation2 + $0x70] sm:$0xff] }
 0x101   :  { %1701 = vmatpush1.bf16.msra.mxu1 %v1700_v39  ;;  %1447 = vmatprep.subr.bf16.mxu0 %v1446_v40  ;;  %v514_v39 = vld [vmem:[#allocation5 + $0xde0] sm:$0xff]  ;;  %v512_v40 = vld [vmem:[#allocation5 + $0xdd0] sm:$0xff] }
 0x102   :  { %1703 = vmatprep.subr.bf16.mxu1 %v1702_v44  ;;  %899 = vmatprep.mubr.f32.mxu0 %v61_v50  ;;  %v523_v44 = vld [vmem:[#allocation5 + $0xe28] sm:$0xff]  ;;  %v1468_v47 = vpack.c.bf16 %v514_v39, %v510_v38  ;;  %v1724_v48 = vpack.c.bf16 %v516_v42, %v512_v40  ;;  %v556_v38 = vld [vmem:[#allocation5 + $0xf30] sm:$0xff]  ;;  %v565_v42 = vld [vmem:[#allocation5 + $0xf78] sm:$0xff] }
 0x103   :  { %1207 = vmatprep.mubr.f32.mxu1 %v61_v50  ;;  %v1470_v49 = vpack.c.bf16 %v523_v44, %v519_v43  ;;  %v518_v50 = vld [vmem:[#allocation5 + $0xe00] sm:$0xff]  ;;  %v559_v39 = vld [vmem:[#allocation5 + $0xf48] sm:$0xff] }
 0x104   :  { %1449 = vmatpush1.bf16.msra.mxu0 %v1448_v51  ;;  %v522_v51 = vld [vmem:[#allocation5 + $0xe20] sm:$0xff]  ;;  %v563_v40 = vld [vmem:[#allocation5 + $0xf68] sm:$0xff] }
 0x105   :  { %1705 = vmatpush1.bf16.msra.mxu1 %v1704_v52  ;;  %1451 = vmatprep.subr.bf16.mxu0 %v1450_v53  ;;  %v520_v52 = vld [vmem:[#allocation5 + $0xe10] sm:$0xff]  ;;  %v1726_v53 = vpack.c.bf16 %v525_v46, %v521_v45  ;;  %v1472_v59 = vpack.c.bf16 %v522_v51, %v518_v50  ;;  %v1490_v45 = vpack.c.bf16 %v563_v40, %v559_v39  ;;  %v558_v46 = vld [vmem:[#allocation5 + $0xf40] sm:$0xff]  ;;  %v567_v51 = vld [vmem:[#allocation5 + $0xf88] sm:$0xff] }
 0x106   :  { %1707 = vmatprep.subr.bf16.mxu1 %v1706_v57  ;;  %v529_v57 = vld [vmem:[#allocation5 + $0xe58] sm:$0xff]  ;;  %v1728_v60 = vpack.c.bf16 %v524_v54, %v520_v52  ;;  %v564_v50 = vld [vmem:[#allocation5 + $0xf70] sm:$0xff]  ;;  %v571_v52 = vld [vmem:[#allocation5 + $0xfa8] sm:$0xff] }
 0x107   :  { %v573_v54 = vld [vmem:[#allocation5 + $0xfb8] sm:$0xff] }
 0x108   :  { %1453 = vmatpush1.bf16.msra.mxu0 %v1452_v63  ;;  %v530_v63 = vld [vmem:[#allocation5 + $0xe60] sm:$0xff] }
 0x109   :  { %1709 = vmatpush1.bf16.msra.mxu1 %v1708_v0  ;;  %1455 = vmatprep.subr.bf16.mxu0 %v1454_v1  ;;  %v528_v0 = vld [vmem:[#allocation5 + $0xe50] sm:$0xff]  ;;  %v1730_v1 = vpack.c.bf16 %v533_v58, %v529_v57  ;;  %v1476_v7 = vpack.c.bf16 %v530_v63, %v526_v62  ;;  %v1494_v57 = vpack.c.bf16 %v571_v52, %v567_v51  ;;  %v566_v58 = vld [vmem:[#allocation5 + $0xf80] sm:$0xff]  ;;  %v575_v63 = vld [vmem:[#allocation5 + $0xfc8] sm:$0xff] }
 0x10a   :  { %1711 = vmatprep.subr.bf16.mxu1 %v1710_v5  ;;  %v537_v5 = vld [vmem:[#allocation5 + $0xe98] sm:$0xff]  ;;  %v1732_v8 = vpack.c.bf16 %v532_v2, %v528_v0  ;;  %v572_v62 = vld [vmem:[#allocation5 + $0xfb0] sm:$0xff]  ;;  %v579_v0 = vld [vmem:[#allocation5 + $0xfe8] sm:$0xff] }
 0x10b   :  { %v581_v2 = vld [vmem:[#allocation5 + $0xff8] sm:$0xff] }
 0x10c   :  { %1457 = vmatpush1.bf16.msra.mxu0 %v1456_v11  ;;  %v538_v11 = vld [vmem:[#allocation5 + $0xea0] sm:$0xff] }
 0x10d   :  { %1713 = vmatpush1.bf16.msra.mxu1 %v1712_v12  ;;  %1459 = vmatprep.subr.bf16.mxu0 %v1458_v13  ;;  %v536_v12 = vld [vmem:[#allocation5 + $0xe90] sm:$0xff]  ;;  %v1734_v13 = vpack.c.bf16 %v541_v6, %v537_v5  ;;  %v1480_v19 = vpack.c.bf16 %v538_v11, %v534_v10  ;;  %v1498_v5 = vpack.c.bf16 %v579_v0, %v575_v63  ;;  %v574_v6 = vld [vmem:[#allocation5 + $0xfc0] sm:$0xff] }
 0x10e   :  { %1715 = vmatprep.subr.bf16.mxu1 %v1714_v17  ;;  %v545_v17 = vld [vmem:[#allocation5 + $0xed8] sm:$0xff]  ;;  %v1736_v20 = vpack.c.bf16 %v540_v14, %v536_v12  ;;  %v580_v10 = vld [vmem:[#allocation5 + $0xff0] sm:$0xff] }
 0x10f   :  { %v69_v14 = vld [vmem:[#allocation2 + $0x78] sm:$0xff] }
 0x110   :  { %1461 = vmatpush1.bf16.msra.mxu0 %v1460_v23  ;;  %v546_v23 = vld [vmem:[#allocation5 + $0xee0] sm:$0xff] }
 0x111   :  { %1717 = vmatpush1.bf16.msra.mxu1 %v1716_v24  ;;  %1463 = vmatprep.subr.bf16.mxu0 %v1462_v25  ;;  %v544_v24 = vld [vmem:[#allocation5 + $0xed0] sm:$0xff]  ;;  %v1738_v25 = vpack.c.bf16 %v549_v18, %v545_v17  ;;  %v1484_v31 = vpack.c.bf16 %v546_v23, %v542_v22  ;;  %v585_v17 = vshrl.u32 %v584_v16, 7 }
 0x112   :  { %1719 = vmatprep.subr.bf16.mxu1 %v1718_v29  ;;  %v553_v29 = vld [vmem:[#allocation5 + $0xf18] sm:$0xff]  ;;  %v1740_v32 = vpack.c.bf16 %v548_v26, %v544_v24 }
 0x113   :  { %v586_v18 = vsub.s32 0, %v585_v17  ;;  %v598_v22 = vsub.s32 3, %v585_v17 }
 0x114   :  { %1465 = vmatpush1.bf16.msra.mxu0 %v1464_v35  ;;  %v554_v35 = vld [vmem:[#allocation5 + $0xf20] sm:$0xff] }
 0x115   :  { %1721 = vmatpush1.bf16.msra.mxu1 %v1720_v36  ;;  %1467 = vmatprep.subr.bf16.mxu0 %v1466_v37  ;;  %v552_v36 = vld [vmem:[#allocation5 + $0xf10] sm:$0xff]  ;;  %v1742_v37 = vpack.c.bf16 %v557_v30, %v553_v29  ;;  %v1488_v43 = vpack.c.bf16 %v554_v35, %v550_v34 }
 0x116   :  { %1723 = vmatprep.subr.bf16.mxu1 %v1722_v41  ;;  %v561_v41 = vld [vmem:[#allocation5 + $0xf58] sm:$0xff]  ;;  %v1744_v44 = vpack.c.bf16 %v556_v38, %v552_v36 }
 0x118   :  { %1469 = vmatpush1.bf16.msra.mxu0 %v1468_v47  ;;  %v562_v47 = vld [vmem:[#allocation5 + $0xf60] sm:$0xff] }
 0x119   :  { %1725 = vmatpush1.bf16.msra.mxu1 %v1724_v48  ;;  %1471 = vmatprep.subr.bf16.mxu0 %v1470_v49  ;;  %v560_v48 = vld [vmem:[#allocation5 + $0xf50] sm:$0xff]  ;;  %v1746_v49 = vpack.c.bf16 %v565_v42, %v561_v41  ;;  %v1492_v55 = vpack.c.bf16 %v562_v47, %v558_v46 }
 0x11a   :  { %1727 = vmatprep.subr.bf16.mxu1 %v1726_v53  ;;  %v569_v53 = vld [vmem:[#allocation5 + $0xf98] sm:$0xff]  ;;  %v1748_v56 = vpack.c.bf16 %v564_v50, %v560_v48 }
 0x11c   :  { %1473 = vmatpush1.bf16.msra.mxu0 %v1472_v59  ;;  %v570_v59 = vld [vmem:[#allocation5 + $0xfa0] sm:$0xff] }
 0x11d   :  { %1729 = vmatpush1.bf16.msra.mxu1 %v1728_v60  ;;  %1475 = vmatprep.subr.bf16.mxu0 %v1474_v61  ;;  %v568_v60 = vld [vmem:[#allocation5 + $0xf90] sm:$0xff]  ;;  %v1750_v61 = vpack.c.bf16 %v573_v54, %v569_v53  ;;  %v1496_v3 = vpack.c.bf16 %v570_v59, %v566_v58 }
 0x11e   :  { %1731 = vmatprep.subr.bf16.mxu1 %v1730_v1  ;;  %v577_v1 = vld [vmem:[#allocation5 + $0xfd8] sm:$0xff]  ;;  %v1752_v4 = vpack.c.bf16 %v572_v62, %v568_v60 }
 0x120   :  { %1477 = vmatpush1.bf16.msra.mxu0 %v1476_v7  ;;  %v578_v7 = vld [vmem:[#allocation5 + $0xfe0] sm:$0xff] }
 0x121   :  { %1733 = vmatpush1.bf16.msra.mxu1 %v1732_v8  ;;  %1479 = vmatprep.subr.bf16.mxu0 %v1478_v9  ;;  %v1754_v8 = vpack.c.bf16 %v581_v2, %v577_v1  ;;  %v576_v9 = vld [vmem:[#allocation5 + $0xfd0] sm:$0xff]  ;;  %v1500_v11 = vpack.c.bf16 %v578_v7, %v574_v6 }
 0x122   :  { %1735 = vmatprep.subr.bf16.mxu1 %v1734_v13  ;;  %v1756_v12 = vpack.c.bf16 %v580_v10, %v576_v9  ;;  %v60_v13 = vld [vmem:[#allocation2 + $0x30] sm:$0xff] }
 0x124   :  { %1481 = vmatpush1.bf16.msra.mxu0 %v1480_v19  ;;  %v582_v19 = vld [vmem:[#allocation7] sm:$0xf] }
 0x125   :  { %1737 = vmatpush1.bf16.msra.mxu1 %v1736_v20  ;;  %1483 = vmatprep.subr.bf16.mxu0 %v1482_v21  ;;  %v594_v20 = vsub.s32 2, %v585_v17  ;;  %v590_v21 = vsub.s32 1, %v585_v17  ;;  %v587_v23 = vrot.slane %v582_v19, %v586_v18  ;;  %v599_v26 = vrot.slane %v582_v19, %v598_v22 }
 0x126   :  { %1739 = vmatprep.subr.bf16.mxu1 %v1738_v25 }
 0x127   :  { %v595_v24 = vrot.slane %v582_v19, %v594_v20  ;;  %v591_v25 = vrot.slane %v582_v19, %v590_v21 }
 0x128   :  { %1485 = vmatpush1.bf16.msra.mxu0 %v1484_v31 }
 0x129   :  { %1741 = vmatpush1.bf16.msra.mxu1 %v1740_v32  ;;  %1487 = vmatprep.subr.bf16.mxu0 %v1486_v33 }
 0x12a   :  { %1743 = vmatprep.subr.bf16.mxu1 %v1742_v37 }
 0x12c   :  { %1489 = vmatpush1.bf16.msra.mxu0 %v1488_v43 }
 0x12d   :  { %1745 = vmatpush1.bf16.msra.mxu1 %v1744_v44  ;;  %1491 = vmatprep.subr.bf16.mxu0 %v1490_v45 }
 0x12e   :  { %1747 = vmatprep.subr.bf16.mxu1 %v1746_v49 }
 0x130   :  { %1493 = vmatpush1.bf16.msra.mxu0 %v1492_v55 }
 0x131   :  { %1749 = vmatpush1.bf16.msra.mxu1 %v1748_v56  ;;  %1495 = vmatprep.subr.bf16.mxu0 %v1494_v57 }
 0x132   :  { %1751 = vmatprep.subr.bf16.mxu1 %v1750_v61 }
 0x134   :  { %1497 = vmatpush1.bf16.msra.mxu0 %v1496_v3 }
 0x135   :  { %1753 = vmatpush1.bf16.msra.mxu1 %v1752_v4  ;;  %1499 = vmatprep.subr.bf16.mxu0 %v1498_v5 }
 0x136   :  { %1755 = vmatprep.subr.bf16.mxu1 %v1754_v8 }
 0x138   :  { %1501 = vmatpush1.bf16.msra.mxu0 %v1500_v11 }
 0x139   :  { %1757 = vmatpush1.bf16.msra.mxu1 %v1756_v12 }
 0x13b   :  { %900 = vmatmul.mubr.f32.vlgmr.msra.gmra.mrb[0].mxu0 %v60_v13 }
 0x13c   :  { %1208 = vmatmul.mubr.f32.vlgmr.msra.gmra.mrb[0].mxu1 %v60_v13  ;;  %905 = vmatprep.mubr.f32.mxu0 %v69_v14 }
 0x13d   :  { %1213 = vmatprep.mubr.f32.mxu1 %v69_v14 }
 0x13f   :  { %906 = vmatmul.mubr.f32.gmra.mrb[2].mxu0 %v68_v15 }
 0x140   :  { %1214 = vmatmul.mubr.f32.gmra.mrb[2].mxu1 %v68_v15 }
 0x20e   :  { %v901_v27 = vpop.f32.mrb[0].mxu0 }
 0x20f   :  { %v1758_v28 = vadd.f32 %v901_v27, %v587_v23  ;;  %v1209_v29 = vpop.f32.mrb[0].mxu1  ;;  %v903_v30 = vpop.f32.mrb[1].mxu0 }
 0x210   :  { %v1762_v31 = vadd.f32 %v1209_v29, %v595_v24  ;;  %v1759_v32 = vadd.f32 %v903_v30, %v591_v25  ;;  %v1211_v33 = vpop.f32.mrb[1].mxu1 }
 0x211   :  { %1220 = vst [vmem:[#allocation8] sm:$0xff] %v1758_v28  ;;  %v1763_v34 = vadd.f32 %v1211_v33, %v599_v26 }
 0x212   :  { %1222 = vst [vmem:[#allocation8 + $0x10] sm:$0xff] %v1762_v31  ;;  %1221 = vst [vmem:[#allocation8 + $0x8] sm:$0xff] %v1759_v32  ;;  %v907_v35 = vpop.f32.mrb[2].mxu0 }
 0x213   :  { %1223 = vst [vmem:[#allocation8 + $0x18] sm:$0xff] %v1763_v34  ;;  %v1760_v36 = vadd.f32 %v907_v35, %v587_v23  ;;  %v1215_v37 = vpop.f32.mrb[2].mxu1  ;;  %v909_v38 = vpop.f32.mrb[3].mxu0 }
 0x214   :  { %v1764_v39 = vadd.f32 %v1215_v37, %v595_v24  ;;  %v1761_v40 = vadd.f32 %v909_v38, %v591_v25  ;;  %v1217_v41 = vpop.f32.mrb[3].mxu1 }
 0x215   :  { %1224 = vst [vmem:[#allocation8 + $0x20] sm:$0xff] %v1760_v36  ;;  %v1765_v42 = vadd.f32 %v1217_v41, %v599_v26 }
 0x216   :  { %1226 = vst [vmem:[#allocation8 + $0x30] sm:$0xff] %v1764_v39  ;;  %1225 = vst [vmem:[#allocation8 + $0x28] sm:$0xff] %v1761_v40 }
 0x217   :  { %1227 = vst [vmem:[#allocation8 + $0x38] sm:$0xff] %v1765_v42 }
 0x218   :  { %1875 = shalt.err (!%p1872_p0)
}
 0x219   :  { %s1876_s29 = scalar_lea.hbm %s1977_s3, 1024 }
 0x21a   :  { %p1877_p1 = scmp.ne.s32.totalorder %s1977_s3, %s1876_s29  ;;  %p1880_p2 = scmp.lt.u32.totalorder %s1876_s29, %s1977_s3 }
 0x21c   :  { %p1882_p3 = pnand %p1880_p2, %p1877_p1 }
 0x21e   :  { %1885 = shalt.err (!%p1882_p3)
}
 0x21f   :  { %1239 = dma.vmem_to_hbm [thread:$0]  %s1234_s25, 1024, %s1977_s3, [#allocation4], %s1893_s22, %s1893_s22, %s1894_s23  }
 0x220   :  { %1890 = dma.done.wait [#allocation4], 1024  }
 0x221   :  { %1891 = vsyncadd [#allocation4], 4294966272 }
 0x222   :  { %1243 = vsyncpa [#allocation3], 1 }
 0x223   :  { %1244 = vsyncpa [#allocation6], 1 }
 0x224   :  { %1245 = vsyncpa [#allocation4], 1 }

</bundles_post_ra>
